<compile_context>
chip_gen: v7x
topology: tpu7x:2x2x1
jax: 0.10.0
libtpu: 0.0.40
codegen_flags: <defaults>
</compile_context>

<pallas_src>
import numpy as np
import jax
import jax.numpy as jnp
from jax import lax
from jax.experimental import pallas as pl
from jax.experimental.pallas import tpu as pltpu

EPS = 1e-5


def _bn_relu(t, g, b, n):
    """Training-mode BN (batch stats, biased variance) + ReLU, single-pass stats.

    t: (C, N) activations; g, b: (C, 1) affine params.
    """
    inv_n = 1.0 / n
    mean = jnp.sum(t, axis=1, keepdims=True) * inv_n            # (C, 1)
    ex2 = jnp.sum(t * t, axis=1, keepdims=True) * inv_n         # E[x^2]
    var = jnp.maximum(ex2 - mean * mean, 0.0)                   # biased variance
    scale = g * lax.rsqrt(var + EPS)
    shift = b - mean * scale
    return jnp.maximum(t * scale + shift, 0.0)                  # fused FMA + ReLU


def make_basic_block_kernel(B, H, W):
    N = B * H * W

    def kernel(x_ref, masks_ref, w1_ref, g1_ref, b1_ref, w2_ref, g2_ref, b2_ref,
               o_ref, patches_ref):
        Cin = x_ref.shape[0]
        Cmid = w1_ref.shape[0]

        x = x_ref[...]                                          # (Cin, N) lane-dense

        def conv3x3(y, w_ref, C):
            # im2col: write the 9 masked, lane-rolled taps into the scratch
            # (sublane-aligned slabs), then a single (Cout, 9C) @ (9C, N) matmul.
            for dy in range(3):
                for dx in range(3):
                    t = dy * 3 + dx
                    off = (dy - 1) * W + (dx - 1)               # flattened-pixel offset
                    tap = y if off == 0 else pltpu.roll(y, (-off) % N, 1)
                    patches_ref[t * C:(t + 1) * C, :] = tap * masks_ref[t]
            return jnp.dot(w_ref[...], patches_ref[...],
                           preferred_element_type=jnp.float32)

        y1 = _bn_relu(x, g1_ref[...], b1_ref[...], N)
        c1 = conv3x3(y1, w1_ref, Cin)
        y2 = _bn_relu(c1, g2_ref[...], b2_ref[...], N)
        c2 = conv3x3(y2, w2_ref, Cmid)
        o_ref[...] = jnp.maximum(c2 + x, 0.0)                   # identity shortcut + ReLU

    return kernel


def _tap_masks(B, H, W):
    """(9, 1, B*H*W) float32 validity masks for the 3x3 SAME-conv taps."""
    h = np.arange(H)[:, None]
    w = np.arange(W)[None, :]
    ms = []
    for dy in range(3):
        for dx in range(3):
            valid = ((h + dy - 1 >= 0) & (h + dy - 1 < H) &
                     (w + dx - 1 >= 0) & (w + dx - 1 < W))      # (H, W)
            ms.append(np.broadcast_to(valid, (B, H, W)).reshape(-1))
    return jnp.asarray(np.stack(ms)[:, None, :].astype(np.float32))


def basic_block_forward(x_nhwc, w1_hwio, g1, b1, w2_hwio, g2, b2):
    """x_nhwc: (B,H,W,Cin); w*_hwio: (3,3,Cin,Cout); g*/b*: (C,). Returns NHWC.

    Layout plumbing (channels -> sublanes, pixels -> lanes; weight im2col
    flattening) is done once outside the kernel by XLA.
    """
    B, H, W, Cin = x_nhwc.shape
    Cmid = w1_hwio.shape[-1]
    assert Cin == Cmid, "identity-shortcut config requires in_planes == planes"
    N = B * H * W

    x_cn = jnp.transpose(x_nhwc, (3, 0, 1, 2)).reshape(Cin, N)
    w1t = jnp.transpose(w1_hwio, (3, 0, 1, 2)).reshape(Cmid, 9 * Cin)
    w2t = jnp.transpose(w2_hwio, (3, 0, 1, 2)).reshape(Cmid, 9 * Cmid)
    masks = _tap_masks(B, H, W)

    out_cn = pl.pallas_call(
        make_basic_block_kernel(B, H, W),
        out_shape=jax.ShapeDtypeStruct((Cmid, N), jnp.float32),
        grid=(1,),
        in_specs=[
            pl.BlockSpec((Cin, N), lambda i: (0, 0)),           # x, lane-dense
            pl.BlockSpec((9, 1, N), lambda i: (0, 0, 0)),       # border masks
            pl.BlockSpec((Cmid, 9 * Cin), lambda i: (0, 0)),    # conv1 weights (im2col)
            pl.BlockSpec((Cin, 1), lambda i: (0, 0)),           # bn1 gamma
            pl.BlockSpec((Cin, 1), lambda i: (0, 0)),           # bn1 beta
            pl.BlockSpec((Cmid, 9 * Cmid), lambda i: (0, 0)),   # conv2 weights (im2col)
            pl.BlockSpec((Cmid, 1), lambda i: (0, 0)),          # bn2 gamma
            pl.BlockSpec((Cmid, 1), lambda i: (0, 0)),          # bn2 beta
        ],
        out_specs=pl.BlockSpec((Cmid, N), lambda i: (0, 0)),    # lane-dense output
        scratch_shapes=[pltpu.VMEM((9 * Cin, N), jnp.float32)], # shared im2col buffer
        compiler_params=pltpu.CompilerParams(
            dimension_semantics=("arbitrary",),
            vmem_limit_bytes=32 * 1024 * 1024),
    )(x_cn, masks, w1t, g1.reshape(Cin, 1), b1.reshape(Cin, 1),
      w2t, g2.reshape(Cmid, 1), b2.reshape(Cmid, 1))

    return jnp.transpose(out_cn.reshape(Cmid, B, H, W), (1, 2, 3, 0))


# ---- plain-JAX reference (for correctness check) ----
def reference(x, w1_hwio, g1, b1, w2_hwio, g2, b2):
    def bn_relu(t, g, b):
        m = jnp.mean(t, axis=(0, 1, 2), keepdims=True)
        v = jnp.mean((t - m) ** 2, axis=(0, 1, 2), keepdims=True)
        return jax.nn.relu((t - m) * lax.rsqrt(v + EPS)
                           * g.reshape(1, 1, 1, -1) + b.reshape(1, 1, 1, -1))

    def conv(t, w):
        return lax.conv_general_dilated(
            t, w, (1, 1), "SAME",
            dimension_numbers=("NHWC", "HWIO", "NHWC"))

    h = conv(bn_relu(x, g1, b1), w1_hwio)
    h = conv(bn_relu(h, g2, b2), w2_hwio)
    return jax.nn.relu(h + x)


if __name__ == "__main__":
    B, C, H, W = 2, 8, 16, 16          # batch, channels (= in_planes = planes), spatial
    key = jax.random.PRNGKey(0)
    k = jax.random.split(key, 7)

    x = jax.random.normal(k[0], (B, H, W, C), jnp.float32)       # NHWC input
    w1_hwio = 0.1 * jax.random.normal(k[1], (3, 3, C, C), jnp.float32)
    w2_hwio = 0.1 * jax.random.normal(k[2], (3, 3, C, C), jnp.float32)
    g1 = 1.0 + 0.1 * jax.random.normal(k[3], (C,), jnp.float32)
    b1 = 0.1 * jax.random.normal(k[4], (C,), jnp.float32)
    g2 = 1.0 + 0.1 * jax.random.normal(k[5], (C,), jnp.float32)
    b2 = 0.1 * jax.random.normal(k[6], (C,), jnp.float32)

    out = basic_block_forward(x, w1_hwio, g1, b1, w2_hwio, g2, b2)
    out = jax.block_until_ready(out)

    ref = reference(x, w1_hwio, g1, b1, w2_hwio, g2, b2)
    err = float(jnp.max(jnp.abs(out - ref)))
    assert jnp.allclose(out, ref, atol=1e-4, rtol=1e-4), f"max abs err = {err}"

    print("KERNEL_OK")
</pallas_src>

<mosaic_0001>
module attributes {stable_mosaic.version = 11 : i64} {
  func.func @kernel(%arg0: i32, %arg1: memref<8x512xf32, #tpu.memory_space<vmem>>, %arg2: memref<9x1x512xf32, #tpu.memory_space<vmem>>, %arg3: memref<8x72xf32, #tpu.memory_space<vmem>>, %arg4: memref<8x1xf32, #tpu.memory_space<vmem>>, %arg5: memref<8x1xf32, #tpu.memory_space<vmem>>, %arg6: memref<8x72xf32, #tpu.memory_space<vmem>>, %arg7: memref<8x1xf32, #tpu.memory_space<vmem>>, %arg8: memref<8x1xf32, #tpu.memory_space<vmem>>, %arg9: memref<8x512xf32, #tpu.memory_space<vmem>>, %arg10: memref<72x512xf32, #tpu.memory_space<vmem>>) attributes {dimension_semantics = [#tpu.dimension_semantics<arbitrary>], iteration_bounds = array<i64: 1>, scalar_prefetch = 0 : i64, scratch_operands = 1 : i64, tpu.core_type = #tpu.core_type<tc>, window_params = [{pipeline_mode = #tpu.pipeline_mode<synchronous>, transform_indices = @transform_0, window_bounds = array<i64: 8, 512>}, {pipeline_mode = #tpu.pipeline_mode<synchronous>, transform_indices = @transform_1, window_bounds = array<i64: 9, 1, 512>}, {pipeline_mode = #tpu.pipeline_mode<synchronous>, transform_indices = @transform_2, window_bounds = array<i64: 8, 72>}, {pipeline_mode = #tpu.pipeline_mode<synchronous>, transform_indices = @transform_3, window_bounds = array<i64: 8, 1>}, {pipeline_mode = #tpu.pipeline_mode<synchronous>, transform_indices = @transform_4, window_bounds = array<i64: 8, 1>}, {pipeline_mode = #tpu.pipeline_mode<synchronous>, transform_indices = @transform_5, window_bounds = array<i64: 8, 72>}, {pipeline_mode = #tpu.pipeline_mode<synchronous>, transform_indices = @transform_6, window_bounds = array<i64: 8, 1>}, {pipeline_mode = #tpu.pipeline_mode<synchronous>, transform_indices = @transform_7, window_bounds = array<i64: 8, 1>}, {pipeline_mode = #tpu.pipeline_mode<synchronous>, transform_indices = @transform_8, window_bounds = array<i64: 8, 512>}]} {
    %c0 = arith.constant 0 : index
    %c0_0 = arith.constant 0 : index
    %0 = vector.load %arg1[%c0, %c0_0] : memref<8x512xf32, #tpu.memory_space<vmem>>, vector<8x512xf32>
    %c0_1 = arith.constant 0 : index
    %c0_2 = arith.constant 0 : index
    %1 = vector.load %arg4[%c0_1, %c0_2] : memref<8x1xf32, #tpu.memory_space<vmem>>, vector<8x1xf32>
    %c0_3 = arith.constant 0 : index
    %c0_4 = arith.constant 0 : index
    %2 = vector.load %arg5[%c0_3, %c0_4] : memref<8x1xf32, #tpu.memory_space<vmem>>, vector<8x1xf32>
    %cst = arith.constant dense<0.000000e+00> : vector<8xf32>
    %3 = vector.multi_reduction <add>, %0, %cst [1] : vector<8x512xf32> to vector<8xf32>
    %4 = vector.shape_cast %3 : vector<8xf32> to vector<8x1xf32>
    %cst_5 = arith.constant 0.001953125 : f32
    %5 = vector.broadcast %cst_5 : f32 to vector<8x1xf32>
    %6 = arith.mulf %4, %5 : vector<8x1xf32>
    %7 = arith.mulf %0, %0 : vector<8x512xf32>
    %cst_6 = arith.constant dense<0.000000e+00> : vector<8xf32>
    %8 = vector.multi_reduction <add>, %7, %cst_6 [1] : vector<8x512xf32> to vector<8xf32>
    %9 = vector.shape_cast %8 : vector<8xf32> to vector<8x1xf32>
    %cst_7 = arith.constant 0.001953125 : f32
    %10 = vector.broadcast %cst_7 : f32 to vector<8x1xf32>
    %11 = arith.mulf %9, %10 : vector<8x1xf32>
    %12 = arith.mulf %6, %6 : vector<8x1xf32>
    %13 = arith.subf %11, %12 : vector<8x1xf32>
    %cst_8 = arith.constant 0.000000e+00 : f32
    %14 = vector.broadcast %cst_8 : f32 to vector<8x1xf32>
    %15 = arith.maximumf %13, %14 : vector<8x1xf32>
    %cst_9 = arith.constant 9.99999974E-6 : f32
    %16 = vector.broadcast %cst_9 : f32 to vector<8x1xf32>
    %17 = arith.addf %15, %16 : vector<8x1xf32>
    %18 = math.rsqrt %17 : vector<8x1xf32>
    %19 = arith.mulf %1, %18 : vector<8x1xf32>
    %20 = arith.mulf %6, %19 : vector<8x1xf32>
    %21 = arith.subf %2, %20 : vector<8x1xf32>
    %22 = vector.broadcast %19 : vector<8x1xf32> to vector<8x512xf32>
    %23 = arith.mulf %0, %22 : vector<8x512xf32>
    %24 = vector.broadcast %21 : vector<8x1xf32> to vector<8x512xf32>
    %25 = arith.addf %23, %24 : vector<8x512xf32>
    %cst_10 = arith.constant 0.000000e+00 : f32
    %26 = vector.broadcast %cst_10 : f32 to vector<8x512xf32>
    %27 = arith.maximumf %25, %26 : vector<8x512xf32>
    %c17_i32 = arith.constant 17 : i32
    %28 = tpu.dynamic_rotate %27 by %c17_i32 dim 1 : vector<8x512xf32>, i32 -> vector<8x512xf32>
    %c0_11 = arith.constant 0 : index
    %c0_12 = arith.constant 0 : index
    %c0_13 = arith.constant 0 : index
    %29 = vector.load %arg2[%c0_11, %c0_12, %c0_13] : memref<9x1x512xf32, #tpu.memory_space<vmem>>, vector<1x1x512xf32>
    %30 = vector.shape_cast %29 : vector<1x1x512xf32> to vector<1x512xf32>
    %31 = vector.broadcast %30 : vector<1x512xf32> to vector<8x512xf32>
    %32 = arith.mulf %28, %31 : vector<8x512xf32>
    %c0_14 = arith.constant 0 : index
    %c0_15 = arith.constant 0 : index
    %33 = vector.load %arg10[%c0_14, %c0_15] : memref<72x512xf32, #tpu.memory_space<vmem>>, vector<8x512xf32>
    tpu.vector_store %arg10[%c0_14, %c0_15], %32 {strides = array<i32>} : memref<72x512xf32, #tpu.memory_space<vmem>>, vector<8x512xf32>,
    %c16_i32 = arith.constant 16 : i32
    %34 = tpu.dynamic_rotate %27 by %c16_i32 dim 1 : vector<8x512xf32>, i32 -> vector<8x512xf32>
    %c1 = arith.constant 1 : index
    %c0_16 = arith.constant 0 : index
    %c0_17 = arith.constant 0 : index
    %35 = vector.load %arg2[%c1, %c0_16, %c0_17] : memref<9x1x512xf32, #tpu.memory_space<vmem>>, vector<1x1x512xf32>
    %36 = vector.shape_cast %35 : vector<1x1x512xf32> to vector<1x512xf32>
    %37 = vector.broadcast %36 : vector<1x512xf32> to vector<8x512xf32>
    %38 = arith.mulf %34, %37 : vector<8x512xf32>
    %c8 = arith.constant 8 : index
    %c0_18 = arith.constant 0 : index
    %39 = vector.load %arg10[%c8, %c0_18] : memref<72x512xf32, #tpu.memory_space<vmem>>, vector<8x512xf32>
    tpu.vector_store %arg10[%c8, %c0_18], %38 {strides = array<i32>} : memref<72x512xf32, #tpu.memory_space<vmem>>, vector<8x512xf32>,
    %c15_i32 = arith.constant 15 : i32
    %40 = tpu.dynamic_rotate %27 by %c15_i32 dim 1 : vector<8x512xf32>, i32 -> vector<8x512xf32>
    %c2 = arith.constant 2 : index
    %c0_19 = arith.constant 0 : index
    %c0_20 = arith.constant 0 : index
    %41 = vector.load %arg2[%c2, %c0_19, %c0_20] : memref<9x1x512xf32, #tpu.memory_space<vmem>>, vector<1x1x512xf32>
    %42 = vector.shape_cast %41 : vector<1x1x512xf32> to vector<1x512xf32>
    %43 = vector.broadcast %42 : vector<1x512xf32> to vector<8x512xf32>
    %44 = arith.mulf %40, %43 : vector<8x512xf32>
    %c16 = arith.constant 16 : index
    %c0_21 = arith.constant 0 : index
    %45 = vector.load %arg10[%c16, %c0_21] : memref<72x512xf32, #tpu.memory_space<vmem>>, vector<8x512xf32>
    tpu.vector_store %arg10[%c16, %c0_21], %44 {strides = array<i32>} : memref<72x512xf32, #tpu.memory_space<vmem>>, vector<8x512xf32>,
    %c1_i32 = arith.constant 1 : i32
    %46 = tpu.dynamic_rotate %27 by %c1_i32 dim 1 : vector<8x512xf32>, i32 -> vector<8x512xf32>
    %c3 = arith.constant 3 : index
    %c0_22 = arith.constant 0 : index
    %c0_23 = arith.constant 0 : index
    %47 = vector.load %arg2[%c3, %c0_22, %c0_23] : memref<9x1x512xf32, #tpu.memory_space<vmem>>, vector<1x1x512xf32>
    %48 = vector.shape_cast %47 : vector<1x1x512xf32> to vector<1x512xf32>
    %49 = vector.broadcast %48 : vector<1x512xf32> to vector<8x512xf32>
    %50 = arith.mulf %46, %49 : vector<8x512xf32>
    %c24 = arith.constant 24 : index
    %c0_24 = arith.constant 0 : index
    %51 = vector.load %arg10[%c24, %c0_24] : memref<72x512xf32, #tpu.memory_space<vmem>>, vector<8x512xf32>
    tpu.vector_store %arg10[%c24, %c0_24], %50 {strides = array<i32>} : memref<72x512xf32, #tpu.memory_space<vmem>>, vector<8x512xf32>,
    %c4 = arith.constant 4 : index
    %c0_25 = arith.constant 0 : index
    %c0_26 = arith.constant 0 : index
    %52 = vector.load %arg2[%c4, %c0_25, %c0_26] : memref<9x1x512xf32, #tpu.memory_space<vmem>>, vector<1x1x512xf32>
    %53 = vector.shape_cast %52 : vector<1x1x512xf32> to vector<1x512xf32>
    %54 = vector.broadcast %53 : vector<1x512xf32> to vector<8x512xf32>
    %55 = arith.mulf %27, %54 : vector<8x512xf32>
    %c32 = arith.constant 32 : index
    %c0_27 = arith.constant 0 : index
    %56 = vector.load %arg10[%c32, %c0_27] : memref<72x512xf32, #tpu.memory_space<vmem>>, vector<8x512xf32>
    tpu.vector_store %arg10[%c32, %c0_27], %55 {strides = array<i32>} : memref<72x512xf32, #tpu.memory_space<vmem>>, vector<8x512xf32>,
    %c511_i32 = arith.constant 511 : i32
    %57 = tpu.dynamic_rotate %27 by %c511_i32 dim 1 : vector<8x512xf32>, i32 -> vector<8x512xf32>
    %c5 = arith.constant 5 : index
    %c0_28 = arith.constant 0 : index
    %c0_29 = arith.constant 0 : index
    %58 = vector.load %arg2[%c5, %c0_28, %c0_29] : memref<9x1x512xf32, #tpu.memory_space<vmem>>, vector<1x1x512xf32>
    %59 = vector.shape_cast %58 : vector<1x1x512xf32> to vector<1x512xf32>
    %60 = vector.broadcast %59 : vector<1x512xf32> to vector<8x512xf32>
    %61 = arith.mulf %57, %60 : vector<8x512xf32>
    %c40 = arith.constant 40 : index
    %c0_30 = arith.constant 0 : index
    %62 = vector.load %arg10[%c40, %c0_30] : memref<72x512xf32, #tpu.memory_space<vmem>>, vector<8x512xf32>
    tpu.vector_store %arg10[%c40, %c0_30], %61 {strides = array<i32>} : memref<72x512xf32, #tpu.memory_space<vmem>>, vector<8x512xf32>,
    %c497_i32 = arith.constant 497 : i32
    %63 = tpu.dynamic_rotate %27 by %c497_i32 dim 1 : vector<8x512xf32>, i32 -> vector<8x512xf32>
    %c6 = arith.constant 6 : index
    %c0_31 = arith.constant 0 : index
    %c0_32 = arith.constant 0 : index
    %64 = vector.load %arg2[%c6, %c0_31, %c0_32] : memref<9x1x512xf32, #tpu.memory_space<vmem>>, vector<1x1x512xf32>
    %65 = vector.shape_cast %64 : vector<1x1x512xf32> to vector<1x512xf32>
    %66 = vector.broadcast %65 : vector<1x512xf32> to vector<8x512xf32>
    %67 = arith.mulf %63, %66 : vector<8x512xf32>
    %c48 = arith.constant 48 : index
    %c0_33 = arith.constant 0 : index
    %68 = vector.load %arg10[%c48, %c0_33] : memref<72x512xf32, #tpu.memory_space<vmem>>, vector<8x512xf32>
    tpu.vector_store %arg10[%c48, %c0_33], %67 {strides = array<i32>} : memref<72x512xf32, #tpu.memory_space<vmem>>, vector<8x512xf32>,
    %c496_i32 = arith.constant 496 : i32
    %69 = tpu.dynamic_rotate %27 by %c496_i32 dim 1 : vector<8x512xf32>, i32 -> vector<8x512xf32>
    %c7 = arith.constant 7 : index
    %c0_34 = arith.constant 0 : index
    %c0_35 = arith.constant 0 : index
    %70 = vector.load %arg2[%c7, %c0_34, %c0_35] : memref<9x1x512xf32, #tpu.memory_space<vmem>>, vector<1x1x512xf32>
    %71 = vector.shape_cast %70 : vector<1x1x512xf32> to vector<1x512xf32>
    %72 = vector.broadcast %71 : vector<1x512xf32> to vector<8x512xf32>
    %73 = arith.mulf %69, %72 : vector<8x512xf32>
    %c56 = arith.constant 56 : index
    %c0_36 = arith.constant 0 : index
    %74 = vector.load %arg10[%c56, %c0_36] : memref<72x512xf32, #tpu.memory_space<vmem>>, vector<8x512xf32>
    tpu.vector_store %arg10[%c56, %c0_36], %73 {strides = array<i32>} : memref<72x512xf32, #tpu.memory_space<vmem>>, vector<8x512xf32>,
    %c495_i32 = arith.constant 495 : i32
    %75 = tpu.dynamic_rotate %27 by %c495_i32 dim 1 : vector<8x512xf32>, i32 -> vector<8x512xf32>
    %c8_37 = arith.constant 8 : index
    %c0_38 = arith.constant 0 : index
    %c0_39 = arith.constant 0 : index
    %76 = vector.load %arg2[%c8_37, %c0_38, %c0_39] : memref<9x1x512xf32, #tpu.memory_space<vmem>>, vector<1x1x512xf32>
    %77 = vector.shape_cast %76 : vector<1x1x512xf32> to vector<1x512xf32>
    %78 = vector.broadcast %77 : vector<1x512xf32> to vector<8x512xf32>
    %79 = arith.mulf %75, %78 : vector<8x512xf32>
    %c64 = arith.constant 64 : index
    %c0_40 = arith.constant 0 : index
    %80 = vector.load %arg10[%c64, %c0_40] : memref<72x512xf32, #tpu.memory_space<vmem>>, vector<8x512xf32>
    tpu.vector_store %arg10[%c64, %c0_40], %79 {strides = array<i32>} : memref<72x512xf32, #tpu.memory_space<vmem>>, vector<8x512xf32>,
    %c0_41 = arith.constant 0 : index
    %c0_42 = arith.constant 0 : index
    %81 = vector.load %arg3[%c0_41, %c0_42] : memref<8x72xf32, #tpu.memory_space<vmem>>, vector<8x72xf32>
    %c0_43 = arith.constant 0 : index
    %c0_44 = arith.constant 0 : index
    %82 = vector.load %arg10[%c0_43, %c0_44] : memref<72x512xf32, #tpu.memory_space<vmem>>, vector<72x512xf32>
    %cst_45 = arith.constant dense<0.000000e+00> : vector<8x512xf32>
    %83 = tpu.matmul %81, %82, %cst_45 {dimension_numbers = #tpu.dot_dimension_numbers<[1], [0], [0], [1], [0, 0, 1, 1], [], []>} : vector<8x72xf32>, vector<72x512xf32>, vector<8x512xf32> -> vector<8x512xf32>
    %c0_46 = arith.constant 0 : index
    %c0_47 = arith.constant 0 : index
    %84 = vector.load %arg7[%c0_46, %c0_47] : memref<8x1xf32, #tpu.memory_space<vmem>>, vector<8x1xf32>
    %c0_48 = arith.constant 0 : index
    %c0_49 = arith.constant 0 : index
    %85 = vector.load %arg8[%c0_48, %c0_49] : memref<8x1xf32, #tpu.memory_space<vmem>>, vector<8x1xf32>
    %cst_50 = arith.constant dense<0.000000e+00> : vector<8xf32>
    %86 = vector.multi_reduction <add>, %83, %cst_50 [1] : vector<8x512xf32> to vector<8xf32>
    %87 = vector.shape_cast %86 : vector<8xf32> to vector<8x1xf32>
    %cst_51 = arith.constant 0.001953125 : f32
    %88 = vector.broadcast %cst_51 : f32 to vector<8x1xf32>
    %89 = arith.mulf %87, %88 : vector<8x1xf32>
    %90 = arith.mulf %83, %83 : vector<8x512xf32>
    %cst_52 = arith.constant dense<0.000000e+00> : vector<8xf32>
    %91 = vector.multi_reduction <add>, %90, %cst_52 [1] : vector<8x512xf32> to vector<8xf32>
    %92 = vector.shape_cast %91 : vector<8xf32> to vector<8x1xf32>
    %cst_53 = arith.constant 0.001953125 : f32
    %93 = vector.broadcast %cst_53 : f32 to vector<8x1xf32>
    %94 = arith.mulf %92, %93 : vector<8x1xf32>
    %95 = arith.mulf %89, %89 : vector<8x1xf32>
    %96 = arith.subf %94, %95 : vector<8x1xf32>
    %cst_54 = arith.constant 0.000000e+00 : f32
    %97 = vector.broadcast %cst_54 : f32 to vector<8x1xf32>
    %98 = arith.maximumf %96, %97 : vector<8x1xf32>
    %cst_55 = arith.constant 9.99999974E-6 : f32
    %99 = vector.broadcast %cst_55 : f32 to vector<8x1xf32>
    %100 = arith.addf %98, %99 : vector<8x1xf32>
    %101 = math.rsqrt %100 : vector<8x1xf32>
    %102 = arith.mulf %84, %101 : vector<8x1xf32>
    %103 = arith.mulf %89, %102 : vector<8x1xf32>
    %104 = arith.subf %85, %103 : vector<8x1xf32>
    %105 = vector.broadcast %102 : vector<8x1xf32> to vector<8x512xf32>
    %106 = arith.mulf %83, %105 : vector<8x512xf32>
    %107 = vector.broadcast %104 : vector<8x1xf32> to vector<8x512xf32>
    %108 = arith.addf %106, %107 : vector<8x512xf32>
    %cst_56 = arith.constant 0.000000e+00 : f32
    %109 = vector.broadcast %cst_56 : f32 to vector<8x512xf32>
    %110 = arith.maximumf %108, %109 : vector<8x512xf32>
    %c17_i32_57 = arith.constant 17 : i32
    %111 = tpu.dynamic_rotate %110 by %c17_i32_57 dim 1 : vector<8x512xf32>, i32 -> vector<8x512xf32>
    %c0_58 = arith.constant 0 : index
    %c0_59 = arith.constant 0 : index
    %c0_60 = arith.constant 0 : index
    %112 = vector.load %arg2[%c0_58, %c0_59, %c0_60] : memref<9x1x512xf32, #tpu.memory_space<vmem>>, vector<1x1x512xf32>
    %113 = vector.shape_cast %112 : vector<1x1x512xf32> to vector<1x512xf32>
    %114 = vector.broadcast %113 : vector<1x512xf32> to vector<8x512xf32>
    %115 = arith.mulf %111, %114 : vector<8x512xf32>
    %c0_61 = arith.constant 0 : index
    %c0_62 = arith.constant 0 : index
    %116 = vector.load %arg10[%c0_61, %c0_62] : memref<72x512xf32, #tpu.memory_space<vmem>>, vector<8x512xf32>
    tpu.vector_store %arg10[%c0_61, %c0_62], %115 {strides = array<i32>} : memref<72x512xf32, #tpu.memory_space<vmem>>, vector<8x512xf32>,
    %c16_i32_63 = arith.constant 16 : i32
    %117 = tpu.dynamic_rotate %110 by %c16_i32_63 dim 1 : vector<8x512xf32>, i32 -> vector<8x512xf32>
    %c1_64 = arith.constant 1 : index
    %c0_65 = arith.constant 0 : index
    %c0_66 = arith.constant 0 : index
    %118 = vector.load %arg2[%c1_64, %c0_65, %c0_66] : memref<9x1x512xf32, #tpu.memory_space<vmem>>, vector<1x1x512xf32>
    %119 = vector.shape_cast %118 : vector<1x1x512xf32> to vector<1x512xf32>
    %120 = vector.broadcast %119 : vector<1x512xf32> to vector<8x512xf32>
    %121 = arith.mulf %117, %120 : vector<8x512xf32>
    %c8_67 = arith.constant 8 : index
    %c0_68 = arith.constant 0 : index
    %122 = vector.load %arg10[%c8_67, %c0_68] : memref<72x512xf32, #tpu.memory_space<vmem>>, vector<8x512xf32>
    tpu.vector_store %arg10[%c8_67, %c0_68], %121 {strides = array<i32>} : memref<72x512xf32, #tpu.memory_space<vmem>>, vector<8x512xf32>,
    %c15_i32_69 = arith.constant 15 : i32
    %123 = tpu.dynamic_rotate %110 by %c15_i32_69 dim 1 : vector<8x512xf32>, i32 -> vector<8x512xf32>
    %c2_70 = arith.constant 2 : index
    %c0_71 = arith.constant 0 : index
    %c0_72 = arith.constant 0 : index
    %124 = vector.load %arg2[%c2_70, %c0_71, %c0_72] : memref<9x1x512xf32, #tpu.memory_space<vmem>>, vector<1x1x512xf32>
    %125 = vector.shape_cast %124 : vector<1x1x512xf32> to vector<1x512xf32>
    %126 = vector.broadcast %125 : vector<1x512xf32> to vector<8x512xf32>
    %127 = arith.mulf %123, %126 : vector<8x512xf32>
    %c16_73 = arith.constant 16 : index
    %c0_74 = arith.constant 0 : index
    %128 = vector.load %arg10[%c16_73, %c0_74] : memref<72x512xf32, #tpu.memory_space<vmem>>, vector<8x512xf32>
    tpu.vector_store %arg10[%c16_73, %c0_74], %127 {strides = array<i32>} : memref<72x512xf32, #tpu.memory_space<vmem>>, vector<8x512xf32>,
    %c1_i32_75 = arith.constant 1 : i32
    %129 = tpu.dynamic_rotate %110 by %c1_i32_75 dim 1 : vector<8x512xf32>, i32 -> vector<8x512xf32>
    %c3_76 = arith.constant 3 : index
    %c0_77 = arith.constant 0 : index
    %c0_78 = arith.constant 0 : index
    %130 = vector.load %arg2[%c3_76, %c0_77, %c0_78] : memref<9x1x512xf32, #tpu.memory_space<vmem>>, vector<1x1x512xf32>
    %131 = vector.shape_cast %130 : vector<1x1x512xf32> to vector<1x512xf32>
    %132 = vector.broadcast %131 : vector<1x512xf32> to vector<8x512xf32>
    %133 = arith.mulf %129, %132 : vector<8x512xf32>
    %c24_79 = arith.constant 24 : index
    %c0_80 = arith.constant 0 : index
    %134 = vector.load %arg10[%c24_79, %c0_80] : memref<72x512xf32, #tpu.memory_space<vmem>>, vector<8x512xf32>
    tpu.vector_store %arg10[%c24_79, %c0_80], %133 {strides = array<i32>} : memref<72x512xf32, #tpu.memory_space<vmem>>, vector<8x512xf32>,
    %c4_81 = arith.constant 4 : index
    %c0_82 = arith.constant 0 : index
    %c0_83 = arith.constant 0 : index
    %135 = vector.load %arg2[%c4_81, %c0_82, %c0_83] : memref<9x1x512xf32, #tpu.memory_space<vmem>>, vector<1x1x512xf32>
    %136 = vector.shape_cast %135 : vector<1x1x512xf32> to vector<1x512xf32>
    %137 = vector.broadcast %136 : vector<1x512xf32> to vector<8x512xf32>
    %138 = arith.mulf %110, %137 : vector<8x512xf32>
    %c32_84 = arith.constant 32 : index
    %c0_85 = arith.constant 0 : index
    %139 = vector.load %arg10[%c32_84, %c0_85] : memref<72x512xf32, #tpu.memory_space<vmem>>, vector<8x512xf32>
    tpu.vector_store %arg10[%c32_84, %c0_85], %138 {strides = array<i32>} : memref<72x512xf32, #tpu.memory_space<vmem>>, vector<8x512xf32>,
    %c511_i32_86 = arith.constant 511 : i32
    %140 = tpu.dynamic_rotate %110 by %c511_i32_86 dim 1 : vector<8x512xf32>, i32 -> vector<8x512xf32>
    %c5_87 = arith.constant 5 : index
    %c0_88 = arith.constant 0 : index
    %c0_89 = arith.constant 0 : index
    %141 = vector.load %arg2[%c5_87, %c0_88, %c0_89] : memref<9x1x512xf32, #tpu.memory_space<vmem>>, vector<1x1x512xf32>
    %142 = vector.shape_cast %141 : vector<1x1x512xf32> to vector<1x512xf32>
    %143 = vector.broadcast %142 : vector<1x512xf32> to vector<8x512xf32>
    %144 = arith.mulf %140, %143 : vector<8x512xf32>
    %c40_90 = arith.constant 40 : index
    %c0_91 = arith.constant 0 : index
    %145 = vector.load %arg10[%c40_90, %c0_91] : memref<72x512xf32, #tpu.memory_space<vmem>>, vector<8x512xf32>
    tpu.vector_store %arg10[%c40_90, %c0_91], %144 {strides = array<i32>} : memref<72x512xf32, #tpu.memory_space<vmem>>, vector<8x512xf32>,
    %c497_i32_92 = arith.constant 497 : i32
    %146 = tpu.dynamic_rotate %110 by %c497_i32_92 dim 1 : vector<8x512xf32>, i32 -> vector<8x512xf32>
    %c6_93 = arith.constant 6 : index
    %c0_94 = arith.constant 0 : index
    %c0_95 = arith.constant 0 : index
    %147 = vector.load %arg2[%c6_93, %c0_94, %c0_95] : memref<9x1x512xf32, #tpu.memory_space<vmem>>, vector<1x1x512xf32>
    %148 = vector.shape_cast %147 : vector<1x1x512xf32> to vector<1x512xf32>
    %149 = vector.broadcast %148 : vector<1x512xf32> to vector<8x512xf32>
    %150 = arith.mulf %146, %149 : vector<8x512xf32>
    %c48_96 = arith.constant 48 : index
    %c0_97 = arith.constant 0 : index
    %151 = vector.load %arg10[%c48_96, %c0_97] : memref<72x512xf32, #tpu.memory_space<vmem>>, vector<8x512xf32>
    tpu.vector_store %arg10[%c48_96, %c0_97], %150 {strides = array<i32>} : memref<72x512xf32, #tpu.memory_space<vmem>>, vector<8x512xf32>,
    %c496_i32_98 = arith.constant 496 : i32
    %152 = tpu.dynamic_rotate %110 by %c496_i32_98 dim 1 : vector<8x512xf32>, i32 -> vector<8x512xf32>
    %c7_99 = arith.constant 7 : index
    %c0_100 = arith.constant 0 : index
    %c0_101 = arith.constant 0 : index
    %153 = vector.load %arg2[%c7_99, %c0_100, %c0_101] : memref<9x1x512xf32, #tpu.memory_space<vmem>>, vector<1x1x512xf32>
    %154 = vector.shape_cast %153 : vector<1x1x512xf32> to vector<1x512xf32>
    %155 = vector.broadcast %154 : vector<1x512xf32> to vector<8x512xf32>
    %156 = arith.mulf %152, %155 : vector<8x512xf32>
    %c56_102 = arith.constant 56 : index
    %c0_103 = arith.constant 0 : index
    %157 = vector.load %arg10[%c56_102, %c0_103] : memref<72x512xf32, #tpu.memory_space<vmem>>, vector<8x512xf32>
    tpu.vector_store %arg10[%c56_102, %c0_103], %156 {strides = array<i32>} : memref<72x512xf32, #tpu.memory_space<vmem>>, vector<8x512xf32>,
    %c495_i32_104 = arith.constant 495 : i32
    %158 = tpu.dynamic_rotate %110 by %c495_i32_104 dim 1 : vector<8x512xf32>, i32 -> vector<8x512xf32>
    %c8_105 = arith.constant 8 : index
    %c0_106 = arith.constant 0 : index
    %c0_107 = arith.constant 0 : index
    %159 = vector.load %arg2[%c8_105, %c0_106, %c0_107] : memref<9x1x512xf32, #tpu.memory_space<vmem>>, vector<1x1x512xf32>
    %160 = vector.shape_cast %159 : vector<1x1x512xf32> to vector<1x512xf32>
    %161 = vector.broadcast %160 : vector<1x512xf32> to vector<8x512xf32>
    %162 = arith.mulf %158, %161 : vector<8x512xf32>
    %c64_108 = arith.constant 64 : index
    %c0_109 = arith.constant 0 : index
    %163 = vector.load %arg10[%c64_108, %c0_109] : memref<72x512xf32, #tpu.memory_space<vmem>>, vector<8x512xf32>
    tpu.vector_store %arg10[%c64_108, %c0_109], %162 {strides = array<i32>} : memref<72x512xf32, #tpu.memory_space<vmem>>, vector<8x512xf32>,
    %c0_110 = arith.constant 0 : index
    %c0_111 = arith.constant 0 : index
    %164 = vector.load %arg6[%c0_110, %c0_111] : memref<8x72xf32, #tpu.memory_space<vmem>>, vector<8x72xf32>
    %c0_112 = arith.constant 0 : index
    %c0_113 = arith.constant 0 : index
    %165 = vector.load %arg10[%c0_112, %c0_113] : memref<72x512xf32, #tpu.memory_space<vmem>>, vector<72x512xf32>
    %cst_114 = arith.constant dense<0.000000e+00> : vector<8x512xf32>
    %166 = tpu.matmul %164, %165, %cst_114 {dimension_numbers = #tpu.dot_dimension_numbers<[1], [0], [0], [1], [0, 0, 1, 1], [], []>} : vector<8x72xf32>, vector<72x512xf32>, vector<8x512xf32> -> vector<8x512xf32>
    %167 = arith.addf %166, %0 : vector<8x512xf32>
    %cst_115 = arith.constant 0.000000e+00 : f32
    %168 = vector.broadcast %cst_115 : f32 to vector<8x512xf32>
    %169 = arith.maximumf %167, %168 : vector<8x512xf32>
    %c0_116 = arith.constant 0 : index
    %c0_117 = arith.constant 0 : index
    %170 = vector.load %arg9[%c0_116, %c0_117] : memref<8x512xf32, #tpu.memory_space<vmem>>, vector<8x512xf32>
    tpu.vector_store %arg9[%c0_116, %c0_117], %169 {strides = array<i32>} : memref<8x512xf32, #tpu.memory_space<vmem>>, vector<8x512xf32>,
    return
  }
  func.func @transform_0(%arg0: i32) -> (i32, i32) {
    %c0_i32 = arith.constant 0 : i32
    %c0_i32_0 = arith.constant 0 : i32
    %c0_i32_1 = arith.constant 0 : i32
    return %c0_i32, %c0_i32_0 : i32, i32
  }
  func.func @transform_1(%arg0: i32) -> (i32, i32, i32) {
    %c0_i32 = arith.constant 0 : i32
    %c0_i32_0 = arith.constant 0 : i32
    %c0_i32_1 = arith.constant 0 : i32
    %c0_i32_2 = arith.constant 0 : i32
    return %c0_i32, %c0_i32_0, %c0_i32_1 : i32, i32, i32
  }
  func.func @transform_2(%arg0: i32) -> (i32, i32) {
    %c0_i32 = arith.constant 0 : i32
    %c0_i32_0 = arith.constant 0 : i32
    %c0_i32_1 = arith.constant 0 : i32
    return %c0_i32, %c0_i32_0 : i32, i32
  }
  func.func @transform_3(%arg0: i32) -> (i32, i32) {
    %c0_i32 = arith.constant 0 : i32
    %c0_i32_0 = arith.constant 0 : i32
    %c0_i32_1 = arith.constant 0 : i32
    return %c0_i32, %c0_i32_0 : i32, i32
  }
  func.func @transform_4(%arg0: i32) -> (i32, i32) {
    %c0_i32 = arith.constant 0 : i32
    %c0_i32_0 = arith.constant 0 : i32
    %c0_i32_1 = arith.constant 0 : i32
    return %c0_i32, %c0_i32_0 : i32, i32
  }
  func.func @transform_5(%arg0: i32) -> (i32, i32) {
    %c0_i32 = arith.constant 0 : i32
    %c0_i32_0 = arith.constant 0 : i32
    %c0_i32_1 = arith.constant 0 : i32
    return %c0_i32, %c0_i32_0 : i32, i32
  }
  func.func @transform_6(%arg0: i32) -> (i32, i32) {
    %c0_i32 = arith.constant 0 : i32
    %c0_i32_0 = arith.constant 0 : i32
    %c0_i32_1 = arith.constant 0 : i32
    return %c0_i32, %c0_i32_0 : i32, i32
  }
  func.func @transform_7(%arg0: i32) -> (i32, i32) {
    %c0_i32 = arith.constant 0 : i32
    %c0_i32_0 = arith.constant 0 : i32
    %c0_i32_1 = arith.constant 0 : i32
    return %c0_i32, %c0_i32_0 : i32, i32
  }
  func.func @transform_8(%arg0: i32) -> (i32, i32) {
    %c0_i32 = arith.constant 0 : i32
    %c0_i32_0 = arith.constant 0 : i32
    %c0_i32_1 = arith.constant 0 : i32
    return %c0_i32, %c0_i32_0 : i32, i32
  }
}

</mosaic_0001>

<bundles_post_ra>
// kernel: tpu_custom_call.1
= control target key start
LH: loop header
LB: loop body
LE: loop exit
PB: predicated region body
PF: predicated region fallthrough
CT: control target
= control target key end

     0   :  { %13 = vsyncpa [#allocation4], 0  ;;  %s2049_s0 = inlined_call_operand.hbm [shape: f32[8,512], index: 0, kind: input, shape index: {}]   ;;  %s2050_s1 = inlined_call_operand.vmem [shape: f32[9,1,512], index: 1, kind: input, shape index: {}]   ;;  %s2051_s2 = inlined_call_operand.hbm [shape: f32[8,72], index: 2, kind: input, shape index: {}]   ;;  %s2052_s3 = inlined_call_operand.vmem [shape: f32[8,1], index: 3, kind: input, shape index: {}]   ;;  %s2053_s4 = inlined_call_operand.vmem [shape: f32[8,1], index: 4, kind: input, shape index: {}]   ;;  %s2054_s5 = inlined_call_operand.vmem [shape: f32[8,72], index: 5, kind: input, shape index: {}]   ;;  %s2055_s6 = inlined_call_operand.vmem [shape: f32[8,1], index: 6, kind: input, shape index: {}]   ;;  %s2056_s7 = inlined_call_operand.vmem [shape: f32[8,1], index: 7, kind: input, shape index: {}]   ;;  %s2057_s8 = inlined_call_operand.hbm [shape: f32[8,512], index: 8, kind: output, shape index: {}]  }
   0x1   :  { %14 = vsyncpa [#allocation7], 0 }
   0x2   :  { %15 = vsyncpa [#allocation5], 0  ;;  %s1472_s27 = smov [#allocation3]   ;;  %s1473_s29 = smov [#allocation6]  }
   0x3   :  { %s22_s28 = sshll.u32 %s1472_s27, 4  ;;  %s34_s30 = sshll.u32 %s1473_s29, 4  ;;  %s23_s28 = int_to_ptr.vmem [resolvable:$true] %s22_s28  ;;  %s35_s30 = int_to_ptr.vmem [resolvable:$true] %s34_s30 }
   0x4   :  { %s1400_s11 = scalar_lea.hbm %s2049_s0, 512 }
   0x5   :  { %p1401_p0 = scmp.ne.s32.totalorder %s2049_s0, %s1400_s11  ;;  %p1404_p1 = scmp.lt.u32.totalorder %s1400_s11, %s2049_s0 }
   0x7   :  { %p1406_p2 = pnand %p1404_p1, %p1401_p0 }
   0x9   :  { %1409 = shalt.err (!%p1406_p2)
}
   0xa   :  { %s1410_s16 = scalar_lea.vmem %s23_s28, 512  ;;  %p1415_p4 = scmp.lt.s32.totalorder %s23_s28, %s23_s28 }
   0xb   :  { %p1411_p3 = scmp.ne.s32.totalorder %s23_s28, %s1410_s16  ;;  %p1416_p5 = scmp.lt.s32.totalorder %s1410_s16, %s1410_s16 }
   0xd   :  { %p1417_p6 = por %p1416_p5, %p1415_p4 }
   0xf   :  { %p1418_p7 = pnand %p1417_p6, %p1411_p3 }
  0x11   :  { %1421 = shalt.err (!%p1418_p7)
}
  0x12   :  { %25 = dma.hbm_to_vmem [thread:$0]  %s2049_s0, 512, %s23_s28, [#allocation4]  }
  0x13   :  { %s1422_s21 = scalar_lea.hbm %s2051_s2, 128 }
  0x14   :  { %p1423_p8 = scmp.ne.s32.totalorder %s2051_s2, %s1422_s21  ;;  %p1426_p9 = scmp.lt.u32.totalorder %s1422_s21, %s2051_s2 }
  0x16   :  { %p1428_p10 = pnand %p1426_p9, %p1423_p8 }
  0x18   :  { %1431 = shalt.err (!%p1428_p10)
}
  0x19   :  { %s1432_s26 = scalar_lea.vmem %s35_s30, 128  ;;  %p1437_p12 = scmp.lt.s32.totalorder %s35_s30, %s35_s30 }
  0x1a   :  { %p1433_p11 = scmp.ne.s32.totalorder %s35_s30, %s1432_s26  ;;  %p1438_p13 = scmp.lt.s32.totalorder %s1432_s26, %s1432_s26 }
  0x1c   :  { %p1439_p0 = por %p1438_p13, %p1437_p12 }
  0x1e   :  { %p1440_p1 = pnand %p1439_p0, %p1433_p11 }
  0x20   :  { %1443 = shalt.err (!%p1440_p1)
}
  0x21   :  { %37 = dma.hbm_to_vmem [thread:$0]  %s2051_s2, 128, %s35_s30, [#allocation7]  }
  0x22   :  { %1466 = dma.done.wait [#allocation4], 512  }
  0x23   :  { %1467 = vsyncadd [#allocation4], 4294966784 }
  0x24   :  { %1468 = dma.done.wait [#allocation7], 128  }
  0x25   :  { %1469 = vsyncadd [#allocation7], 4294967168  ;;  %v54_v0 = vld [vmem:[#allocation3] sm:$0xff]  ;;  %v55_v1 = vld [vmem:[#allocation3 + $0x8] sm:$0xff]  ;;  %v1474_v14 = vmov 0   ;;  %s1477_s9 = smov 15   ;;  %v114_v44 = vlaneseq }
  0x26   :  { %v56_v2 = vld [vmem:[#allocation3 + $0x10] sm:$0xff]  ;;  %v60_v3 = vadd.f32 %v55_v1, %v54_v0  ;;  %v66_v4 = vmul.f32 %v54_v0, %v54_v0  ;;  %v67_v5 = vmul.f32 %v55_v1, %v55_v1  ;;  %v57_v7 = vld [vmem:[#allocation3 + $0x18] sm:$0xff]  ;;  %1390 = vset.pattern.permute.xlu1 %v1474_v14  ;;  %1391 = vset.pattern.permute.xlu0 %v1474_v14  ;;  %v58_v23 = vld [vmem:[%s2052_s3] sm:$0xff]  ;;  %s1475_s3 = smov 17   ;;  %s1478_s10 = smov 1   ;;  %v1483_v43 = vmov 0.0  }
  0x27   :  { %v68_v6 = vmul.f32 %v56_v2, %v56_v2  ;;  %v69_v9 = vmul.f32 %v57_v7, %v57_v7  ;;  %v59_v26 = vld [vmem:[%s2053_s4] sm:$0xff]  ;;  %s1476_s4 = smov 16   ;;  %s1479_s11 = smov 127   ;;  %595 = vmatprep.mubr.f32.mxu0 %v1483_v43  ;;  %666 = vmatprep.mubr.f32.mxu1 %v1483_v43  ;;  %v1634_v46 = vand.u32 127, %v114_v44  ;;  %v124_v47 = vshrl.u32 %v114_v44, 7 }
  0x28   :  { %v61_v8 = vadd.f32 %v60_v3, %v56_v2  ;;  %v70_v10 = vadd.f32 %v67_v5, %v66_v4  ;;  %s1480_s12 = smov 113   ;;  %s1481_s13 = smov 112   ;;  %v1293_v49 = vld [vmem:[%s2050_s1 + $0x4] sm:$0xf]  ;;  %v121_v50 = vld [vmem:[%s2050_s1] sm:$0xf] }
  0x29   :  { %s1482_s14 = smov 111   ;;  %vm116_vm0 = vcmp.lt.s32.totalorder %v1634_v46, 17  ;;  %v1643_v51 = vsub.s32 1, %v124_v47  ;;  %vm159_vm1 = vcmp.lt.s32.totalorder %v1634_v46, 16  ;;  %v1654_v62 = vsub.s32 0, %v124_v47 }
  0x2a   :  { %v62_v11 = vadd.f32 %v61_v8, %v57_v7  ;;  %v71_v12 = vadd.f32 %v70_v10, %v68_v6  ;;  %v1660_v4 = vsub.s32 2, %v124_v47  ;;  %v1662_v5 = vsub.s32 3, %v124_v47 }
  0x2b   :  { %v130_v54 = vrot.slane %v121_v50, %v1643_v51  ;;  %v174_v55 = vrot.slane %v1293_v49, %v1643_v51  ;;  %v170_v3 = vrot.slane %v1293_v49, %v1654_v62  ;;  %vm203_vm2 = vcmp.lt.s32.totalorder %v1634_v46, 15 }
  0x2c   :  { %63 = vadd.xlane.f32.xlu0 %v62_v11  ;;  %v72_v13 = vadd.f32 %v71_v12, %v69_v9  ;;  %v178_v9 = vrot.slane %v1293_v49, %v1660_v4  ;;  %v182_v11 = vrot.slane %v1293_v49, %v1662_v5  ;;  %v134_v14 = vrot.slane %v121_v50, %v1660_v4 }
  0x2d   :  { %vm247_vm3 = vcmp.lt.s32.totalorder %v1634_v46, 1  ;;  %vm322_vm4 = vcmp.lt.s32.totalorder %v1634_v46, 127  ;;  %vm366_vm5 = vcmp.lt.s32.totalorder %v1634_v46, 113  ;;  %vm410_vm6 = vcmp.lt.s32.totalorder %v1634_v46, 112 }
  0x2e   :  { %vm454_vm7 = vcmp.lt.s32.totalorder %v1634_v46, 111  ;;  %vm527_vm8 = vcmask 588800   ;;  %v1398_v46 = vld [vmem:[#allocation3 + $0x10] sm:$0xff] }
  0x30   :  { %73 = vadd.xlane.f32.xlu0 %v72_v13 }
  0xb9   :  { %v64_v15 = vpop.xlane.xlu0 %63 }
  0xba   :  { %v65_v16 = vmul.f32 0.001953125, %v64_v15  ;;  %v138_v15 = vrot.slane %v121_v50, %v1662_v5 }
  0xbc   :  { %v76_v18 = vmul.f32 %v65_v16, %v65_v16 }
  0xbd   :  { %v74_v17 = vpop.xlane.xlu0 %73 }
  0xbe   :  { %v75_v19 = vmul.f32 0.001953125, %v74_v17 }
  0xc0   :  { %v77_v20 = vsub.f32 %v75_v19, %v76_v18 }
  0xc2   :  { %v78_v21 = vmax.f32 %v77_v20, 0.0 }
  0xc4   :  { %v79_v22 = vadd.f32 1e-05, %v78_v21 }
  0xc6   :  { %1392 = vrsqrt.f32 %v79_v22 }
  0xd0   :  { %v1393_v24 = vpop.eup %1392 }
  0xd1   :  { %v81_v25 = vmul.f32 %v1393_v24, %v58_v23 }
  0xd3   :  { %86 = vperm.xlu1 %1390, %v81_v25   ;;  %v82_v27 = vmul.f32 %v81_v25, %v65_v16 }
  0xd5   :  { %v83_v28 = vsub.f32 %v59_v26, %v82_v27  ;;  %v1294_v27 = vld [vmem:[%s2050_s1 + $0x8] sm:$0xf] }
  0xd7   :  { %95 = vperm.xlu1 %1390, %v83_v28  }
 0x152   :  { %v87_v29 = vpop.permute.xlu1 %86 }
 0x153   :  { %v89_v30 = vmul.f32 %v87_v29, %v54_v0  ;;  %v90_v31 = vmul.f32 %v87_v29, %v55_v1  ;;  %v91_v33 = vmul.f32 %v87_v29, %v56_v2  ;;  %v92_v40 = vmul.f32 %v87_v29, %v57_v7 }
 0x154   :  { %v126_v2 = vrot.slane %v121_v50, %v1654_v62 }
 0x156   :  { %v96_v32 = vpop.permute.xlu1 %95 }
 0x157   :  { %v98_v34 = vadd.f32 %v96_v32, %v89_v30  ;;  %v99_v35 = vadd.f32 %v96_v32, %v90_v31  ;;  %v100_v36 = vadd.f32 %v96_v32, %v91_v33  ;;  %v101_v41 = vadd.f32 %v96_v32, %v92_v40  ;;  %v1295_v32 = vld [vmem:[%s2050_s1 + $0xc] sm:$0xf] }
 0x158   :  { %v218_v33 = vrot.slane %v1294_v27, %v1643_v51 }
 0x159   :  { %v1560_v37 = vmax.f32 %v98_v34, 0.0  ;;  %v1562_v38 = vmax.f32 %v99_v35, 0.0  ;;  %v1568_v39 = vmax.f32 %v100_v36, 0.0  ;;  %v1578_v42 = vmax.f32 %v101_v41, 0.0 }
 0x15a   :  { %v262_v34 = vrot.slane %v1295_v32, %v1643_v51 }
 0x15b   :  { %108 = vrot.lane.b32.xlu1 %v1562_v38, %s1475_s3  ;;  %106 = vrot.lane.b32.xlu0 %v1560_v37, %s1475_s3 }
 0x15f   :  { %151 = vrot.lane.b32.xlu1 %v1560_v37, %s1476_s4  ;;  %155 = vrot.lane.b32.xlu0 %v1568_v39, %s1476_s4 }
 0x163   :  { %153 = vrot.lane.b32.xlu1 %v1562_v38, %s1476_s4  ;;  %197 = vrot.lane.b32.xlu0 %v1562_v38, %s1477_s9 }
 0x167   :  { %112 = vrot.lane.b32.xlu1 %v1578_v42, %s1475_s3  ;;  %241 = vrot.lane.b32.xlu0 %v1562_v38, %s1478_s10 }
 0x16b   :  { %157 = vrot.lane.b32.xlu1 %v1578_v42, %s1476_s4  ;;  %245 = vrot.lane.b32.xlu0 %v1578_v42, %s1478_s10 }
 0x16f   :  { %110 = vrot.lane.b32.xlu1 %v1568_v39, %s1475_s3  ;;  %243 = vrot.lane.b32.xlu0 %v1568_v39, %s1478_s10 }
 0x173   :  { %195 = vrot.lane.b32.xlu1 %v1560_v37, %s1477_s9  ;;  %318 = vrot.lane.b32.xlu0 %v1568_v39, %s1479_s11 }
 0x177   :  { %239 = vrot.lane.b32.xlu1 %v1560_v37, %s1478_s10  ;;  %320 = vrot.lane.b32.xlu0 %v1578_v42, %s1479_s11 }
 0x17b   :  { %201 = vrot.lane.b32.xlu1 %v1578_v42, %s1477_s9  ;;  %362 = vrot.lane.b32.xlu0 %v1568_v39, %s1480_s12 }
 0x17f   :  { %199 = vrot.lane.b32.xlu1 %v1568_v39, %s1477_s9  ;;  %406 = vrot.lane.b32.xlu0 %v1568_v39, %s1481_s13 }
 0x183   :  { %316 = vrot.lane.b32.xlu1 %v1562_v38, %s1479_s11  ;;  %402 = vrot.lane.b32.xlu0 %v1560_v37, %s1481_s13 }
 0x187   :  { %314 = vrot.lane.b32.xlu1 %v1560_v37, %s1479_s11  ;;  %408 = vrot.lane.b32.xlu0 %v1578_v42, %s1481_s13 }
 0x18b   :  { %360 = vrot.lane.b32.xlu1 %v1562_v38, %s1480_s12  ;;  %450 = vrot.lane.b32.xlu0 %v1568_v39, %s1482_s14 }
 0x18f   :  { %404 = vrot.lane.b32.xlu1 %v1562_v38, %s1481_s13  ;;  %452 = vrot.lane.b32.xlu0 %v1578_v42, %s1482_s14 }
 0x193   :  { %358 = vrot.lane.b32.xlu1 %v1560_v37, %s1480_s12 }
 0x197   :  { %364 = vrot.lane.b32.xlu1 %v1578_v42, %s1480_s12 }
 0x19b   :  { %448 = vrot.lane.b32.xlu1 %v1562_v38, %s1482_s14 }
 0x19f   :  { %446 = vrot.lane.b32.xlu1 %v1560_v37, %s1482_s14 }
 0x1cd   :  { %v109_v45 = vpop.permute.xlu1 %108  ;;  %v107_v48 = vpop.permute.xlu0 %106 }
 0x1ce   :  { %v119_v56 = vsel %vm116_vm0, %v107_v48, %v109_v45 }
 0x1cf   :  { %v144_v60 = vmul.f32 %v130_v54, %v119_v56  ;;  %v270_v54 = vrot.slane %v1295_v32, %v1662_v5 }
 0x1d1   :  { %v152_v52 = vpop.permute.xlu1 %151  ;;  %v156_v53 = vpop.permute.xlu0 %155 }
 0x1d5   :  { %v154_v57 = vpop.permute.xlu1 %153  ;;  %v1650_v58 = vpop.permute.xlu0 %197 }
 0x1d6   :  { %v162_v59 = vsel %vm159_vm1, %v152_v52, %v154_v57  ;;  %v161_v16 = vsel %vm159_vm1, %v154_v57, %v156_v53 }
 0x1d7   :  { %v188_v61 = vmul.f32 %v174_v55, %v162_v59  ;;  %v189_v23 = vmul.f32 %v178_v9, %v161_v16  ;;  %v222_v59 = vrot.slane %v1294_v27, %v1660_v4 }
 0x1d9   :  { %v113_v63 = vpop.permute.xlu1 %112  ;;  %v1656_v0 = vpop.permute.xlu0 %241  ;;  %v1313_v1 = vpack.c.bf16 %v188_v61, %v144_v60  ;;  %v226_v60 = vrot.slane %v1294_v27, %v1662_v5  ;;  %v1296_v61 = vld [vmem:[%s2050_s1 + $0x10] sm:$0xf] }
 0x1da   :  { %v120_v6 = vsel %vm116_vm0, %v113_v63, %v107_v48  ;;  %v214_v48 = vrot.slane %v1294_v27, %v1654_v62  ;;  %v297_v27 = vrot.slane %v1296_v61, %v1660_v4 }
 0x1db   :  { %1314 = vmatprep.subr.bf16.mxu0 %v1313_v1  ;;  %v143_v12 = vmul.f32 %v126_v2, %v120_v6 }
 0x1dd   :  { %v158_v7 = vpop.permute.xlu1 %157  ;;  %v246_v8 = vpop.permute.xlu0 %245 }
 0x1de   :  { %v163_v10 = vsel %vm159_vm1, %v158_v7, %v152_v52  ;;  %v160_v17 = vsel %vm159_vm1, %v156_v53, %v158_v7  ;;  %v266_v53 = vrot.slane %v1295_v32, %v1660_v4 }
 0x1df   :  { %v187_v13 = vmul.f32 %v170_v3, %v163_v10  ;;  %v190_v26 = vmul.f32 %v182_v11, %v160_v17  ;;  %v1297_v3 = vld [vmem:[%s2050_s1 + $0x14] sm:$0xf]  ;;  %v293_v11 = vrot.slane %v1296_v61, %v1643_v51 }
 0x1e1   :  { %v111_v18 = vpop.permute.xlu1 %110  ;;  %v244_v19 = vpop.permute.xlu0 %243  ;;  %v1315_v20 = vpack.c.bf16 %v187_v13, %v143_v12 }
 0x1e2   :  { %v117_v21 = vsel %vm116_vm0, %v111_v18, %v113_v63  ;;  %v118_v22 = vsel %vm116_vm0, %v109_v45, %v111_v18  ;;  %v258_v45 = vrot.slane %v1295_v32, %v1654_v62  ;;  %v248_v63 = vsel %vm247_vm3, %v244_v19, %v246_v8 }
 0x1e3   :  { %v145_v24 = vmul.f32 %v134_v14, %v118_v22  ;;  %1316 = vmatpush1.bf16.msra.mxu0 %v1315_v20  ;;  %v146_v25 = vmul.f32 %v138_v15, %v117_v21  ;;  %v249_v1 = vsel %vm247_vm3, %v1656_v0, %v244_v19  ;;  %v278_v12 = vmul.f32 %v270_v54, %v248_v63 }
 0x1e4   :  { %v289_v18 = vrot.slane %v1296_v61, %v1654_v62  ;;  %v341_v19 = vrot.slane %v1297_v3, %v1660_v4  ;;  %v307_v21 = vmul.f32 %v293_v11, %v1562_v38  ;;  %v301_v22 = vrot.slane %v1296_v61, %v1662_v5 }
 0x1e5   :  { %v196_v28 = vpop.permute.xlu1 %195  ;;  %v319_v29 = vpop.permute.xlu0 %318  ;;  %v1329_v30 = vpack.c.bf16 %v190_v26, %v146_v25  ;;  %v1331_v31 = vpack.c.bf16 %v189_v23, %v145_v24  ;;  %v333_v25 = vrot.slane %v1297_v3, %v1654_v62  ;;  %v345_v26 = vrot.slane %v1297_v3, %v1662_v5 }
 0x1e6   :  { %v206_v35 = vsel %vm203_vm2, %v196_v28, %v1650_v58 }
 0x1e7   :  { %1330 = vmatprep.subr.bf16.mxu1 %v1329_v30  ;;  %v232_v44 = vmul.f32 %v218_v33, %v206_v35  ;;  %v309_v35 = vmul.f32 %v301_v22, %v1578_v42 }
 0x1e8   :  { %1332 = vmatpush1.bf16.msra.mxu1 %v1331_v31 }
 0x1e9   :  { %v240_v36 = vpop.permute.xlu1 %239  ;;  %v321_v41 = vpop.permute.xlu0 %320 }
 0x1ea   :  { %v250_v40 = vsel %vm247_vm3, %v240_v36, %v1656_v0  ;;  %v251_v49 = vsel %vm247_vm3, %v246_v8, %v240_v36  ;;  %v337_v8 = vrot.slane %v1297_v3, %v1643_v51  ;;  %v277_v0 = vmul.f32 %v266_v53, %v249_v1 }
 0x1eb   :  { %v276_v47 = vmul.f32 %v262_v34, %v250_v40  ;;  %v275_v56 = vmul.f32 %v258_v45, %v251_v49  ;;  %v323_v23 = vsel %vm322_vm4, %v319_v29, %v321_v41  ;;  %v306_v34 = vmul.f32 %v289_v18, %v1560_v37  ;;  %v1298_v40 = vld [vmem:[%s2050_s1 + $0x18] sm:$0xf] }
 0x1ec   :  { %v352_v31 = vmul.f32 %v341_v19, %v323_v23  ;;  %v381_v37 = vrot.slane %v1298_v40, %v1643_v51 }
 0x1ed   :  { %v202_v50 = vpop.permute.xlu1 %201  ;;  %v1317_v52 = vpack.c.bf16 %v276_v47, %v232_v44  ;;  %v1714_v2 = vpop.permute.xlu0 %362  ;;  %v308_v44 = vmul.f32 %v297_v27, %v1568_v39 }
 0x1ee   :  { %v207_v55 = vsel %vm203_vm2, %v202_v50, %v196_v28 }
 0x1ef   :  { %v231_v57 = vmul.f32 %v214_v48, %v207_v55  ;;  %1318 = vmatprep.subr.bf16.mxu0 %v1317_v52  ;;  %v1339_v49 = vpack.c.bf16 %v352_v31, %v308_v44 }
 0x1f1   :  { %v200_v6 = vpop.permute.xlu1 %199  ;;  %v1319_v7 = vpack.c.bf16 %v275_v56, %v231_v57  ;;  %v407_v20 = vpop.permute.xlu0 %406  ;;  %v377_v57 = vrot.slane %v1298_v40, %v1654_v62 }
 0x1f2   :  { %v204_v9 = vsel %vm203_vm2, %v200_v6, %v202_v50  ;;  %v205_v10 = vsel %vm203_vm2, %v1650_v58, %v200_v6 }
 0x1f3   :  { %v233_v13 = vmul.f32 %v222_v59, %v205_v10  ;;  %v234_v14 = vmul.f32 %v226_v60, %v204_v9  ;;  %1320 = vmatpush1.bf16.msra.mxu0 %v1319_v7  ;;  %v385_v9 = vrot.slane %v1298_v40, %v1660_v4  ;;  %v389_v10 = vrot.slane %v1298_v40, %v1662_v5 }
 0x1f5   :  { %v317_v15 = vpop.permute.xlu1 %316  ;;  %v1333_v16 = vpack.c.bf16 %v278_v12, %v234_v14  ;;  %v1335_v17 = vpack.c.bf16 %v277_v0, %v233_v13  ;;  %v403_v36 = vpop.permute.xlu0 %402  ;;  %v1300_v12 = vld [vmem:[%s2050_s1 + $0x20] sm:$0xf] }
 0x1f6   :  { %v324_v58 = vsel %vm322_vm4, %v317_v15, %v319_v29  ;;  %v477_v27 = vrot.slane %v1300_v12, %v1662_v5 }
 0x1f7   :  { %v351_v24 = vmul.f32 %v337_v8, %v324_v58  ;;  %1334 = vmatprep.subr.bf16.mxu1 %v1333_v16 }
 0x1f8   :  { %1336 = vmatpush1.bf16.msra.mxu1 %v1335_v17  ;;  %v469_v17 = vrot.slane %v1300_v12, %v1643_v51 }
 0x1f9   :  { %v315_v28 = vpop.permute.xlu1 %314  ;;  %v1321_v30 = vpack.c.bf16 %v351_v24, %v307_v21  ;;  %v409_v52 = vpop.permute.xlu0 %408 }
 0x1fa   :  { %v325_v38 = vsel %vm322_vm4, %v315_v28, %v317_v15  ;;  %v326_v32 = vsel %vm322_vm4, %v321_v41, %v315_v28  ;;  %v1299_v41 = vld [vmem:[%s2050_s1 + $0x1c] sm:$0xf]  ;;  %v411_v8 = vsel %vm410_vm6, %v407_v20, %v409_v52  ;;  %v414_v11 = vsel %vm410_vm6, %v409_v52, %v403_v36 }
 0x1fb   :  { %v350_v33 = vmul.f32 %v333_v25, %v325_v38  ;;  %v353_v29 = vmul.f32 %v345_v26, %v326_v32  ;;  %1322 = vmatprep.subr.bf16.mxu0 %v1321_v30  ;;  %v425_v42 = vrot.slane %v1299_v41, %v1643_v51  ;;  %v421_v55 = vrot.slane %v1299_v41, %v1654_v62 }
 0x1fc   :  { %v429_v63 = vrot.slane %v1299_v41, %v1660_v4  ;;  %v433_v1 = vrot.slane %v1299_v41, %v1662_v5  ;;  %v465_v26 = vrot.slane %v1300_v12, %v1654_v62  ;;  %v473_v28 = vrot.slane %v1300_v12, %v1660_v4 }
 0x1fd   :  { %v361_v45 = vpop.permute.xlu1 %360  ;;  %v1323_v47 = vpack.c.bf16 %v350_v33, %v306_v34  ;;  %v1337_v48 = vpack.c.bf16 %v353_v29, %v309_v35  ;;  %v451_v0 = vpop.permute.xlu0 %450  ;;  %v490_v34 = vld [vmem:[#allocation6] sm:$0xff] }
 0x1fe   :  { %v368_v39 = vsel %vm366_vm5, %v361_v45, %v1714_v2  ;;  %v440_v18 = vmul.f32 %v429_v63, %v411_v8  ;;  %v441_v19 = vmul.f32 %v433_v1, %v414_v11  ;;  %v673_v63 = vld [vmem:[%s2055_s6] sm:$0xff] }
 0x1ff   :  { %1324 = vmatpush1.bf16.msra.mxu0 %v1323_v47  ;;  %1338 = vmatprep.subr.bf16.mxu1 %v1337_v48  ;;  %v395_v54 = vmul.f32 %v381_v37, %v368_v39 }
 0x200   :  { %1340 = vmatpush1.bf16.msra.mxu1 %v1339_v49 }
 0x201   :  { %v405_v50 = vpop.permute.xlu1 %404  ;;  %v453_v24 = vpop.permute.xlu0 %452 }
 0x202   :  { %v412_v53 = vsel %vm410_vm6, %v405_v50, %v407_v20  ;;  %v413_v59 = vsel %vm410_vm6, %v403_v36, %v405_v50  ;;  %v455_v30 = vsel %vm454_vm7, %v451_v0, %v453_v24 }
 0x203   :  { %v439_v56 = vmul.f32 %v425_v42, %v412_v53  ;;  %v438_v6 = vmul.f32 %v421_v55, %v413_v59  ;;  %v484_v35 = vmul.f32 %v473_v28, %v455_v30  ;;  %v733_v28 = vld [vmem:[%s2050_s1] sm:$0xf]  ;;  %v1303_v30 = vld [vmem:[%s2050_s1 + $0x4] sm:$0xf] }
 0x205   :  { %v359_v60 = vpop.permute.xlu1 %358  ;;  %v1325_v61 = vpack.c.bf16 %v439_v56, %v395_v54 }
 0x206   :  { %v369_v3 = vsel %vm366_vm5, %v359_v60, %v361_v45 }
 0x207   :  { %v394_v7 = vmul.f32 %v377_v57, %v369_v3  ;;  %1326 = vmatprep.subr.bf16.mxu0 %v1325_v61 }
 0x209   :  { %v365_v13 = vpop.permute.xlu1 %364  ;;  %v1327_v14 = vpack.c.bf16 %v438_v6, %v394_v7  ;;  %v674_v6 = vld [vmem:[%s2056_s7] sm:$0xff] }
 0x20a   :  { %v367_v15 = vsel %vm366_vm5, %v1714_v2, %v365_v13  ;;  %v370_v16 = vsel %vm366_vm5, %v365_v13, %v359_v60 }
 0x20b   :  { %v396_v20 = vmul.f32 %v385_v9, %v367_v15  ;;  %v397_v58 = vmul.f32 %v389_v10, %v370_v16  ;;  %1328 = vmatpush1.bf16.msra.mxu0 %v1327_v14 }
 0x20d   :  { %v449_v21 = vpop.permute.xlu1 %448  ;;  %v1341_v22 = vpack.c.bf16 %v441_v19, %v397_v58  ;;  %v1343_v23 = vpack.c.bf16 %v440_v18, %v396_v20 }
 0x20e   :  { %v456_v25 = vsel %vm454_vm7, %v449_v21, %v451_v0 }
 0x20f   :  { %v483_v2 = vmul.f32 %v469_v17, %v456_v25  ;;  %1342 = vmatprep.subr.bf16.mxu1 %v1341_v22 }
 0x210   :  { %1344 = vmatpush1.bf16.msra.mxu1 %v1343_v23 }
 0x211   :  { %v447_v31 = vpop.permute.xlu1 %446  ;;  %547 = vmatprep.subr.mxu0 %v483_v2 }
 0x212   :  { %v457_v38 = vsel %vm454_vm7, %v447_v31, %v449_v21  ;;  %v458_v32 = vsel %vm454_vm7, %v453_v24, %v447_v31 }
 0x213   :  { %v482_v33 = vmul.f32 %v465_v26, %v457_v38  ;;  %v485_v29 = vmul.f32 %v477_v27, %v458_v32  ;;  %v742_v38 = vrot.slane %v733_v28, %v1643_v51  ;;  %v784_v32 = vrot.slane %v1303_v30, %v1643_v51 }
 0x215   :  { %548 = vmatpush1.msra.mxu0 %v482_v33  ;;  %618 = vmatprep.subr.mxu1 %v485_v29  ;;  %v738_v29 = vrot.slane %v733_v28, %v1654_v62 }
 0x216   :  { %1301 = vmatmul.mubr.msk.f32.vlgmr.msra.gmra.mrb[0].mxu0 %vm527_vm8, %v490_v34  ;;  %619 = vmatpush1.msra.mxu1 %v484_v35 }
 0x217   :  { %1302 = vmatmul.mubr.msk.f32.vlgmr.msra.gmra.mrb[0].mxu1 %vm527_vm8, %v490_v34  ;;  %1191 = vmatprep.mubr.f32.mxu0 %v1483_v43 }
 0x218   :  { %1262 = vmatprep.mubr.f32.mxu1 %v1483_v43 }
 0x2e9   :  { %v597_v36 = vpop.f32.mrb[0].mxu0 }
 0x2ea   :  { %v681_v40 = vmul.f32 %v597_v36, %v597_v36  ;;  %v599_v44 = vpop.f32.mrb[1].mxu0  ;;  %v668_v45 = vpop.f32.mrb[0].mxu1 }
 0x2eb   :  { %v675_v47 = vadd.f32 %v599_v44, %v597_v36  ;;  %v682_v48 = vmul.f32 %v599_v44, %v599_v44  ;;  %v683_v41 = vmul.f32 %v668_v45, %v668_v45  ;;  %v670_v49 = vpop.f32.mrb[1].mxu1 }
 0x2ec   :  { %v684_v50 = vmul.f32 %v670_v49, %v670_v49 }
 0x2ed   :  { %v676_v37 = vadd.f32 %v675_v47, %v668_v45  ;;  %v685_v42 = vadd.f32 %v682_v48, %v681_v40  ;;  %v788_v40 = vrot.slane %v1303_v30, %v1660_v4 }
 0x2ef   :  { %v677_v39 = vadd.f32 %v676_v37, %v670_v49  ;;  %v686_v52 = vadd.f32 %v685_v42, %v683_v41  ;;  %v746_v37 = vrot.slane %v733_v28, %v1660_v4 }
 0x2f1   :  { %678 = vadd.xlane.f32.xlu1 %v677_v39  ;;  %v687_v53 = vadd.f32 %v686_v52, %v684_v50 }
 0x2f3   :  { %688 = vadd.xlane.f32.xlu0 %v687_v53 }
 0x37e   :  { %v679_v54 = vpop.xlane.xlu1 %678 }
 0x37f   :  { %v680_v55 = vmul.f32 0.001953125, %v679_v54 }
 0x380   :  { %v689_v56 = vpop.xlane.xlu0 %688 }
 0x381   :  { %v691_v43 = vmul.f32 %v680_v55, %v680_v55  ;;  %v690_v57 = vmul.f32 0.001953125, %v689_v56 }
 0x383   :  { %v692_v59 = vsub.f32 %v690_v57, %v691_v43 }
 0x385   :  { %v693_v60 = vmax.f32 %v692_v59, 0.0 }
 0x387   :  { %v694_v61 = vadd.f32 1e-05, %v693_v60 }
 0x389   :  { %1394 = vrsqrt.f32 %v694_v61 }
 0x393   :  { %v1395_v1 = vpop.eup %1394 }
 0x394   :  { %v696_v3 = vmul.f32 %v1395_v1, %v673_v63 }
 0x396   :  { %701 = vperm.xlu0 %1391, %v696_v3   ;;  %v697_v7 = vmul.f32 %v696_v3, %v680_v55 }
 0x398   :  { %v698_v9 = vsub.f32 %v674_v6, %v697_v7 }
 0x39a   :  { %710 = vperm.xlu1 %1390, %v698_v9   ;;  %v1304_v9 = vld [vmem:[%s2050_s1 + $0x8] sm:$0xf] }
 0x415   :  { %v702_v10 = vpop.permute.xlu0 %701 }
 0x416   :  { %v704_v8 = vmul.f32 %v702_v10, %v597_v36  ;;  %v706_v11 = vmul.f32 %v702_v10, %v668_v45  ;;  %v705_v12 = vmul.f32 %v702_v10, %v599_v44  ;;  %v707_v19 = vmul.f32 %v702_v10, %v670_v49  ;;  %v1305_v10 = vld [vmem:[%s2050_s1 + $0xc] sm:$0xf] }
 0x417   :  { %v750_v36 = vrot.slane %v733_v28, %v1662_v5  ;;  %v780_v45 = vrot.slane %v1303_v30, %v1654_v62  ;;  %v792_v49 = vrot.slane %v1303_v30, %v1662_v5 }
 0x419   :  { %v711_v0 = vpop.permute.xlu1 %710 }
 0x41a   :  { %v713_v13 = vadd.f32 %v711_v0, %v704_v8  ;;  %v715_v14 = vadd.f32 %v711_v0, %v706_v11  ;;  %v714_v15 = vadd.f32 %v711_v0, %v705_v12  ;;  %v716_v20 = vadd.f32 %v711_v0, %v707_v19  ;;  %v1306_v19 = vld [vmem:[%s2050_s1 + $0x10] sm:$0xf] }
 0x41b   :  { %v826_v0 = vrot.slane %v1304_v9, %v1643_v51  ;;  %v868_v12 = vrot.slane %v1305_v10, %v1643_v51 }
 0x41c   :  { %v1805_v16 = vmax.f32 %v713_v13, 0.0  ;;  %v1807_v17 = vmax.f32 %v715_v14, 0.0  ;;  %v1813_v18 = vmax.f32 %v714_v15, 0.0  ;;  %v1823_v58 = vmax.f32 %v716_v20, 0.0 }
 0x41d   :  { %v822_v14 = vrot.slane %v1304_v9, %v1654_v62  ;;  %v834_v20 = vrot.slane %v1304_v9, %v1662_v5 }
 0x41e   :  { %767 = vrot.lane.b32.xlu0 %v1807_v17, %s1476_s4  ;;  %721 = vrot.lane.b32.xlu1 %v1805_v16, %s1475_s3 }
 0x422   :  { %805 = vrot.lane.b32.xlu0 %v1805_v16, %s1477_s9  ;;  %723 = vrot.lane.b32.xlu1 %v1813_v18, %s1475_s3 }
 0x426   :  { %809 = vrot.lane.b32.xlu0 %v1807_v17, %s1477_s9  ;;  %725 = vrot.lane.b32.xlu1 %v1807_v17, %s1475_s3 }
 0x42a   :  { %847 = vrot.lane.b32.xlu0 %v1805_v16, %s1478_s10  ;;  %727 = vrot.lane.b32.xlu1 %v1823_v58, %s1475_s3 }
 0x42e   :  { %851 = vrot.lane.b32.xlu0 %v1807_v17, %s1478_s10  ;;  %763 = vrot.lane.b32.xlu1 %v1805_v16, %s1476_s4 }
 0x432   :  { %919 = vrot.lane.b32.xlu0 %v1805_v16, %s1479_s11  ;;  %765 = vrot.lane.b32.xlu1 %v1813_v18, %s1476_s4 }
 0x436   :  { %923 = vrot.lane.b32.xlu0 %v1807_v17, %s1479_s11  ;;  %769 = vrot.lane.b32.xlu1 %v1823_v58, %s1476_s4 }
 0x43a   :  { %961 = vrot.lane.b32.xlu0 %v1805_v16, %s1480_s12  ;;  %807 = vrot.lane.b32.xlu1 %v1813_v18, %s1477_s9 }
 0x43e   :  { %965 = vrot.lane.b32.xlu0 %v1807_v17, %s1480_s12  ;;  %811 = vrot.lane.b32.xlu1 %v1823_v58, %s1477_s9 }
 0x442   :  { %1003 = vrot.lane.b32.xlu0 %v1805_v16, %s1481_s13  ;;  %849 = vrot.lane.b32.xlu1 %v1813_v18, %s1478_s10 }
 0x446   :  { %1007 = vrot.lane.b32.xlu0 %v1807_v17, %s1481_s13  ;;  %853 = vrot.lane.b32.xlu1 %v1823_v58, %s1478_s10 }
 0x44a   :  { %1045 = vrot.lane.b32.xlu0 %v1805_v16, %s1482_s14  ;;  %921 = vrot.lane.b32.xlu1 %v1813_v18, %s1479_s11 }
 0x44e   :  { %1049 = vrot.lane.b32.xlu0 %v1807_v17, %s1482_s14  ;;  %925 = vrot.lane.b32.xlu1 %v1823_v58, %s1479_s11 }
 0x452   :  { %963 = vrot.lane.b32.xlu1 %v1813_v18, %s1480_s12 }
 0x456   :  { %967 = vrot.lane.b32.xlu1 %v1823_v58, %s1480_s12 }
 0x45a   :  { %1005 = vrot.lane.b32.xlu1 %v1813_v18, %s1481_s13 }
 0x45e   :  { %1009 = vrot.lane.b32.xlu1 %v1823_v58, %s1481_s13 }
 0x462   :  { %1047 = vrot.lane.b32.xlu1 %v1813_v18, %s1482_s14 }
 0x466   :  { %1051 = vrot.lane.b32.xlu1 %v1823_v58, %s1482_s14 }
 0x490   :  { %v768_v21 = vpop.permute.xlu0 %767  ;;  %v722_v22 = vpop.permute.xlu1 %721 }
 0x494   :  { %v1877_v23 = vpop.permute.xlu0 %805  ;;  %v724_v24 = vpop.permute.xlu1 %723 }
 0x495   :  { %v731_v33 = vsel %vm116_vm0, %v722_v22, %v724_v24 }
 0x496   :  { %v756_v47 = vmul.f32 %v742_v38, %v731_v33  ;;  %v876_v38 = vrot.slane %v1305_v10, %v1662_v5 }
 0x498   :  { %v1879_v25 = vpop.permute.xlu0 %809  ;;  %v726_v2 = vpop.permute.xlu1 %725 }
 0x499   :  { %v730_v50 = vsel %vm116_vm0, %v724_v24, %v726_v2  ;;  %v864_v24 = vrot.slane %v1305_v10, %v1654_v62 }
 0x49a   :  { %v757_v63 = vmul.f32 %v746_v37, %v730_v50 }
 0x49c   :  { %v728_v26 = vpop.permute.xlu1 %727  ;;  %v1881_v27 = vpop.permute.xlu0 %847 }
 0x49d   :  { %v729_v42 = vsel %vm116_vm0, %v726_v2, %v728_v26  ;;  %v732_v39 = vsel %vm116_vm0, %v728_v26, %v722_v22  ;;  %v1307_v2 = vld [vmem:[%s2050_s1 + $0x14] sm:$0xf] }
 0x49e   :  { %v755_v43 = vmul.f32 %v738_v29, %v732_v39  ;;  %v758_v57 = vmul.f32 %v750_v36, %v729_v42 }
 0x4a0   :  { %v764_v31 = vpop.permute.xlu1 %763  ;;  %v1894_v34 = vpop.permute.xlu0 %851 }
 0x4a4   :  { %v766_v35 = vpop.permute.xlu1 %765  ;;  %v1915_v59 = vpop.permute.xlu0 %919 }
 0x4a5   :  { %v773_v44 = vsel %vm159_vm1, %v764_v31, %v766_v35  ;;  %v772_v48 = vsel %vm159_vm1, %v766_v35, %v768_v21  ;;  %v894_v35 = vrot.slane %v1306_v19, %v1654_v62 }
 0x4a6   :  { %v798_v41 = vmul.f32 %v784_v32, %v773_v44  ;;  %v799_v54 = vmul.f32 %v788_v40, %v772_v48  ;;  %v830_v32 = vrot.slane %v1304_v9, %v1660_v4 }
 0x4a8   :  { %v770_v52 = vpop.permute.xlu1 %769  ;;  %v1345_v53 = vpack.c.bf16 %v798_v41, %v756_v47  ;;  %v1363_v7 = vpack.c.bf16 %v799_v54, %v757_v63  ;;  %v924_v8 = vpop.permute.xlu0 %923  ;;  %v898_v47 = vrot.slane %v1306_v19, %v1643_v51  ;;  %v944_v63 = vrot.slane %v1307_v2, %v1660_v4 }
 0x4a9   :  { %v771_v55 = vsel %vm159_vm1, %v768_v21, %v770_v52  ;;  %v774_v56 = vsel %vm159_vm1, %v770_v52, %v764_v31  ;;  %v872_v21 = vrot.slane %v1305_v10, %v1660_v4  ;;  %v902_v52 = vrot.slane %v1306_v19, %v1660_v4 }
 0x4aa   :  { %v797_v60 = vmul.f32 %v780_v45, %v774_v56  ;;  %v800_v61 = vmul.f32 %v792_v49, %v771_v55  ;;  %1346 = vmatprep.subr.bf16.mxu0 %v1345_v53  ;;  %v936_v45 = vrot.slane %v1307_v2, %v1654_v62  ;;  %v940_v49 = vrot.slane %v1307_v2, %v1643_v51 }
 0x4ab   :  { %v906_v53 = vrot.slane %v1306_v19, %v1662_v5 }
 0x4ac   :  { %v1347_v1 = vpack.c.bf16 %v797_v60, %v755_v43  ;;  %v808_v3 = vpop.permute.xlu1 %807  ;;  %v1361_v6 = vpack.c.bf16 %v800_v61, %v758_v57  ;;  %v1941_v26 = vpop.permute.xlu0 %961 }
 0x4ad   :  { %v815_v13 = vsel %vm203_vm2, %v1877_v23, %v808_v3  ;;  %v814_v36 = vsel %vm203_vm2, %v808_v3, %v1879_v25 }
 0x4ae   :  { %1348 = vmatpush1.bf16.msra.mxu0 %v1347_v1  ;;  %1362 = vmatprep.subr.bf16.mxu1 %v1361_v6  ;;  %v840_v28 = vmul.f32 %v826_v0, %v815_v13  ;;  %v841_v50 = vmul.f32 %v830_v32, %v814_v36  ;;  %v948_v6 = vrot.slane %v1307_v2, %v1662_v5 }
 0x4af   :  { %1364 = vmatpush1.bf16.msra.mxu1 %v1363_v7  ;;  %v913_v0 = vmul.f32 %v902_v52, %v1807_v17 }
 0x4b0   :  { %v812_v11 = vpop.permute.xlu1 %811  ;;  %v966_v54 = vpop.permute.xlu0 %965 }
 0x4b1   :  { %v813_v33 = vsel %vm203_vm2, %v1879_v25, %v812_v11  ;;  %v816_v29 = vsel %vm203_vm2, %v812_v11, %v1877_v23 }
 0x4b2   :  { %v839_v37 = vmul.f32 %v822_v14, %v816_v29  ;;  %v842_v42 = vmul.f32 %v834_v20, %v813_v33  ;;  %v914_v14 = vmul.f32 %v906_v53, %v1823_v58 }
 0x4b4   :  { %v850_v15 = vpop.permute.xlu1 %849  ;;  %v1004_v11 = vpop.permute.xlu0 %1003 }
 0x4b5   :  { %v857_v22 = vsel %vm247_vm3, %v1881_v27, %v850_v15  ;;  %v856_v30 = vsel %vm247_vm3, %v850_v15, %v1894_v34 }
 0x4b6   :  { %v882_v31 = vmul.f32 %v868_v12, %v857_v22  ;;  %v883_v48 = vmul.f32 %v872_v21, %v856_v30 }
 0x4b8   :  { %v854_v40 = vpop.permute.xlu1 %853  ;;  %v1349_v44 = vpack.c.bf16 %v882_v31, %v840_v28  ;;  %v1367_v57 = vpack.c.bf16 %v883_v48, %v841_v50  ;;  %v1008_v17 = vpop.permute.xlu0 %1007 }
 0x4b9   :  { %v855_v41 = vsel %vm247_vm3, %v1894_v34, %v854_v40  ;;  %v858_v23 = vsel %vm247_vm3, %v854_v40, %v1881_v27  ;;  %v911_v34 = vmul.f32 %v894_v35, %v1805_v16  ;;  %v912_v27 = vmul.f32 %v898_v47, %v1813_v18 }
 0x4ba   :  { %v881_v25 = vmul.f32 %v864_v24, %v858_v23  ;;  %v884_v39 = vmul.f32 %v876_v38, %v855_v41  ;;  %1350 = vmatprep.subr.bf16.mxu0 %v1349_v44  ;;  %v1310_v41 = vld [vmem:[%s2050_s1 + $0x20] sm:$0xf] }
 0x4bb   :  { %v1062_v52 = vrot.slane %v1310_v41, %v1654_v62  ;;  %v1066_v53 = vrot.slane %v1310_v41, %v1643_v51 }
 0x4bc   :  { %v1351_v55 = vpack.c.bf16 %v881_v25, %v839_v37  ;;  %v922_v56 = vpop.permute.xlu1 %921  ;;  %v1365_v43 = vpack.c.bf16 %v884_v39, %v842_v42  ;;  %v1046_v40 = vpop.permute.xlu0 %1045 }
 0x4bd   :  { %v928_v60 = vsel %vm322_vm4, %v922_v56, %v924_v8  ;;  %v929_v61 = vsel %vm322_vm4, %v1915_v59, %v922_v56 }
 0x4be   :  { %v953_v1 = vmul.f32 %v936_v45, %v929_v61  ;;  %v954_v3 = vmul.f32 %v940_v49, %v928_v60  ;;  %1352 = vmatpush1.bf16.msra.mxu0 %v1351_v55  ;;  %1366 = vmatprep.subr.bf16.mxu1 %v1365_v43 }
 0x4bf   :  { %1368 = vmatpush1.bf16.msra.mxu1 %v1367_v57 }
 0x4c0   :  { %v1355_v16 = vpack.c.bf16 %v953_v1, %v911_v34  ;;  %v926_v7 = vpop.permute.xlu1 %925  ;;  %v1353_v18 = vpack.c.bf16 %v954_v3, %v912_v27  ;;  %v1074_v1 = vrot.slane %v1310_v41, %v1662_v5  ;;  %v1087_v3 = vld [vmem:[%s2054_s5] sm:$0xff]  ;;  %s1484_s5 = smov [#allocation8]  }
 0x4c1   :  { %v927_v9 = vsel %vm322_vm4, %v924_v8, %v926_v7  ;;  %v930_v10 = vsel %vm322_vm4, %v926_v7, %v1915_v59  ;;  %v1308_v8 = vld [vmem:[%s2050_s1 + $0x18] sm:$0xf]  ;;  %v1309_v59 = vld [vmem:[%s2050_s1 + $0x1c] sm:$0xf]  ;;  %s1283_s27 = sshll.u32 %s1484_s5, 4  ;;  %s1284_s27 = int_to_ptr.vmem [resolvable:$true] %s1283_s27 }
 0x4c2   :  { %v955_v12 = vmul.f32 %v944_v63, %v927_v9  ;;  %v956_v13 = vmul.f32 %v948_v6, %v930_v10  ;;  %1354 = vmatprep.subr.bf16.mxu0 %v1353_v18  ;;  %v978_v22 = vrot.slane %v1308_v8, %v1654_v62  ;;  %v982_v58 = vrot.slane %v1308_v8, %v1643_v51  ;;  %s1444_s2 = scalar_lea.vmem %s1284_s27, 512  ;;  %p1449_p3 = scmp.lt.s32.totalorder %s1284_s27, %s1284_s27 }
 0x4c3   :  { %1356 = vmatpush1.bf16.msra.mxu0 %v1355_v16  ;;  %v1020_v24 = vrot.slane %v1309_v59, %v1654_v62  ;;  %v1024_v2 = vrot.slane %v1309_v59, %v1643_v51  ;;  %v986_v31 = vrot.slane %v1308_v8, %v1660_v4  ;;  %v990_v38 = vrot.slane %v1308_v8, %v1662_v5  ;;  %v1399_v8 = vld [vmem:[#allocation3 + $0x18] sm:$0xff]  ;;  %p1445_p2 = scmp.ne.s32.totalorder %s1284_s27, %s1444_s2  ;;  %p1450_p4 = scmp.lt.s32.totalorder %s1444_s2, %s1444_s2 }
 0x4c4   :  { %v1371_v15 = vpack.c.bf16 %v955_v12, %v913_v0  ;;  %v964_v19 = vpop.permute.xlu1 %963  ;;  %v1369_v20 = vpack.c.bf16 %v956_v13, %v914_v14  ;;  %v1028_v35 = vrot.slane %v1309_v59, %v1660_v4  ;;  %v1032_v36 = vrot.slane %v1309_v59, %v1662_v5  ;;  %v1396_v5 = vld [vmem:[#allocation3] sm:$0xff]  ;;  %v1397_v0 = vld [vmem:[#allocation3 + $0x8] sm:$0xff] }
 0x4c5   :  { %v970_v28 = vsel %vm366_vm5, %v964_v19, %v966_v54  ;;  %v971_v30 = vsel %vm366_vm5, %v1941_v26, %v964_v19  ;;  %v1070_v51 = vrot.slane %v1310_v41, %v1660_v4  ;;  %p1451_p5 = por %p1450_p4, %p1449_p3 }
 0x4c6   :  { %1370 = vmatprep.subr.bf16.mxu1 %v1369_v20  ;;  %v995_v44 = vmul.f32 %v978_v22, %v971_v30  ;;  %v996_v45 = vmul.f32 %v982_v58, %v970_v28 }
 0x4c7   :  { %1372 = vmatpush1.bf16.msra.mxu1 %v1371_v15  ;;  %p1452_p6 = pnand %p1451_p5, %p1445_p2 }
 0x4c8   :  { %v968_v21 = vpop.permute.xlu1 %967 }
 0x4c9   :  { %v969_v23 = vsel %vm366_vm5, %v966_v54, %v968_v21  ;;  %v972_v49 = vsel %vm366_vm5, %v968_v21, %v1941_v26  ;;  %v1050_v26 = vpop.permute.xlu0 %1049 }
 0x4ca   :  { %v997_v55 = vmul.f32 %v986_v31, %v969_v23  ;;  %v998_v56 = vmul.f32 %v990_v38, %v972_v49 }
 0x4cc   :  { %v1006_v32 = vpop.permute.xlu1 %1005 }
 0x4cd   :  { %v1012_v33 = vsel %vm410_vm6, %v1006_v32, %v1008_v17  ;;  %v1013_v29 = vsel %vm410_vm6, %v1004_v11, %v1006_v32 }
 0x4ce   :  { %v1037_v47 = vmul.f32 %v1020_v24, %v1013_v29  ;;  %v1038_v48 = vmul.f32 %v1024_v2, %v1012_v33 }
 0x4d0   :  { %v1359_v37 = vpack.c.bf16 %v1037_v47, %v995_v44  ;;  %v1010_v42 = vpop.permute.xlu1 %1009  ;;  %v1357_v25 = vpack.c.bf16 %v1038_v48, %v996_v45 }
 0x4d1   :  { %v1011_v39 = vsel %vm410_vm6, %v1008_v17, %v1010_v42  ;;  %v1014_v50 = vsel %vm410_vm6, %v1010_v42, %v1004_v11 }
 0x4d2   :  { %v1039_v54 = vmul.f32 %v1028_v35, %v1011_v39  ;;  %v1040_v34 = vmul.f32 %v1032_v36, %v1014_v50  ;;  %1358 = vmatprep.subr.bf16.mxu0 %v1357_v25 }
 0x4d3   :  { %1360 = vmatpush1.bf16.msra.mxu0 %v1359_v37 }
 0x4d4   :  { %v1375_v43 = vpack.c.bf16 %v1039_v54, %v997_v55  ;;  %v1048_v27 = vpop.permute.xlu1 %1047  ;;  %v1373_v57 = vpack.c.bf16 %v1040_v34, %v998_v56 }
 0x4d5   :  { %v1054_v60 = vsel %vm454_vm7, %v1048_v27, %v1050_v26  ;;  %v1055_v61 = vsel %vm454_vm7, %v1046_v40, %v1048_v27 }
 0x4d6   :  { %v1079_v63 = vmul.f32 %v1062_v52, %v1055_v61  ;;  %v1080_v62 = vmul.f32 %v1066_v53, %v1054_v60  ;;  %1374 = vmatprep.subr.bf16.mxu1 %v1373_v57 }
 0x4d7   :  { %1376 = vmatpush1.bf16.msra.mxu1 %v1375_v43 }
 0x4d8   :  { %v1052_v6 = vpop.permute.xlu1 %1051  ;;  %1143 = vmatprep.subr.mxu0 %v1080_v62 }
 0x4d9   :  { %v1053_v16 = vsel %vm454_vm7, %v1050_v26, %v1052_v6  ;;  %v1056_v7 = vsel %vm454_vm7, %v1052_v6, %v1046_v40  ;;  %1144 = vmatpush1.msra.mxu0 %v1079_v63 }
 0x4da   :  { %v1081_v18 = vmul.f32 %v1070_v51, %v1053_v16  ;;  %v1082_v9 = vmul.f32 %v1074_v1, %v1056_v7  ;;  %1311 = vmatmul.mubr.msk.f32.vlgmr.msra.gmra.mrb[2].mxu0 %vm527_vm8, %v1087_v3 }
 0x4dc   :  { %1214 = vmatprep.subr.mxu1 %v1082_v9 }
 0x4dd   :  { %1215 = vmatpush1.msra.mxu1 %v1081_v18 }
 0x4de   :  { %1312 = vmatmul.mubr.msk.f32.vlgmr.msra.gmra.mrb[2].mxu1 %vm527_vm8, %v1087_v3 }
 0x5ad   :  { %v1193_v4 = vpop.f32.mrb[2].mxu0 }
 0x5ae   :  { %v1194_v10 = vadd.f32 %v1396_v5, %v1193_v4  ;;  %v1195_v11 = vpop.f32.mrb[3].mxu0 }
 0x5af   :  { %v1196_v12 = vadd.f32 %v1397_v0, %v1195_v11 }
 0x5b0   :  { %v1269_v13 = vmax.f32 %v1194_v10, 0.0 }
 0x5b1   :  { %v1270_v14 = vmax.f32 %v1196_v12, 0.0  ;;  %v1264_v15 = vpop.f32.mrb[2].mxu1 }
 0x5b2   :  { %1273 = vst [vmem:[#allocation8] sm:$0xff] %v1269_v13  ;;  %v1265_v19 = vadd.f32 %v1398_v46, %v1264_v15  ;;  %v1266_v20 = vpop.f32.mrb[3].mxu1 }
 0x5b3   :  { %1274 = vst [vmem:[#allocation8 + $0x8] sm:$0xff] %v1270_v14  ;;  %v1267_v59 = vadd.f32 %v1399_v8, %v1266_v20 }
 0x5b4   :  { %v1271_v17 = vmax.f32 %v1265_v19, 0.0 }
 0x5b5   :  { %v1272_v21 = vmax.f32 %v1267_v59, 0.0 }
 0x5b6   :  { %1275 = vst [vmem:[#allocation8 + $0x10] sm:$0xff] %v1271_v17 }
 0x5b7   :  { %1276 = vst [vmem:[#allocation8 + $0x18] sm:$0xff] %v1272_v21 }
 0x5b8   :  { %1455 = shalt.err (!%p1452_p6)
}
 0x5b9   :  { %s1456_s30 = scalar_lea.hbm %s2057_s8, 512 }
 0x5ba   :  { %p1457_p7 = scmp.ne.s32.totalorder %s2057_s8, %s1456_s30  ;;  %p1460_p8 = scmp.lt.u32.totalorder %s1456_s30, %s2057_s8 }
 0x5bc   :  { %p1462_p9 = pnand %p1460_p8, %p1457_p7 }
 0x5be   :  { %1465 = shalt.err (!%p1462_p9)
}
 0x5bf   :  { %1286 = dma.vmem_to_hbm [thread:$0]  %s1284_s27, 512, %s2057_s8, [#allocation5]  }
 0x5c0   :  { %1470 = dma.done.wait [#allocation5], 512  }
 0x5c1   :  { %1471 = vsyncadd [#allocation5], 4294966784 }
 0x5c2   :  { %1290 = vsyncpa [#allocation4], 1 }
 0x5c3   :  { %1291 = vsyncpa [#allocation7], 1 }
 0x5c4   :  { %1292 = vsyncpa [#allocation5], 1 }

</bundles_post_ra>
